<compile_context>
chip_gen: v7x
topology: tpu7x:2x2x1
jax: 0.10.0
libtpu: 0.0.40
codegen_flags: <defaults>
</compile_context>

<pallas_src>
import functools

import numpy as np

import jax
import jax.numpy as jnp
from jax import lax
from jax.experimental import pallas as pl
from jax.experimental.pallas import tpu as pltpu


# ------------------------------ fused kernel --------------------------------

def _cnn_kernel(x_ref, w1_ref, b1_ref, w2_ref, b2_ref, wfc_ref, bfc_ref,
                o_ref, zd_ref):
    f32 = jnp.float32

    xp = x_ref[0]                                     # (30, 28)  H-padded input

    # ---- conv1 (1 -> 8, 3x3, pad 1) + bias + ReLU ---------------------------
    # lane layout of y1: (w % 2) * 128 + (w // 2) * 8 + cout
    acc1 = jnp.zeros((28, 256), f32)
    for kh in range(3):
        acc1 = acc1 + jnp.dot(xp[kh:kh + 28, :], w1_ref[kh],
                              preferred_element_type=f32)
    y1 = jnp.maximum(acc1 + b1_ref[...], 0.0)         # (28, 256)

    # ---- maxpool 2x2 (stage 1) ---------------------------------------------
    mh1 = jnp.maximum(y1[0:27, :], y1[1:28, :])       # rows: valid at r = 2*h2
    mw1 = jnp.maximum(mh1[:, 0:128], mh1[:, 128:256])  # (27,128) lanes w2*8+ci

    # row-dilated, H-zero-padded conv2 input (rows 2 + 2*h2 hold pooled rows)
    zd_ref[...] = jnp.zeros_like(zd_ref)              # (32, 128)
    zd_ref[2:29, :] = mw1

    # ---- conv2 (8 -> 16, 3x3, pad 1) + bias + ReLU --------------------------
    # lane layout of y2: (w % 2) * 128 + (w // 2) * 16 + cout
    acc2 = jnp.zeros((27, 256), f32)
    for kh in range(3):
        acc2 = acc2 + jnp.dot(zd_ref[2 * kh: 2 * kh + 27, :], w2_ref[kh],
                              preferred_element_type=f32)
    y2 = jnp.maximum(acc2 + b2_ref[...], 0.0)         # valid at even rows

    # ---- maxpool 2x2 (stage 2) ---------------------------------------------
    mh2 = jnp.maximum(y2[0:25, :], y2[2:27, :])       # valid at rows r = 4*h
    mw2 = jnp.maximum(mh2[:, 0:128], mh2[:, 128:256])  # (25,128) lanes w*16+co

    # ---- fc (16*7*7 -> 10) + softmax ----------------------------------------
    logits = bfc_ref[...]                             # (1, 10)
    for h in range(7):
        logits = logits + jnp.dot(mw2[4 * h: 4 * h + 1, :], wfc_ref[h],
                                  preferred_element_type=f32)
    m = jnp.max(logits, axis=-1, keepdims=True)
    e = jnp.exp(logits - m)
    s = jnp.sum(e, axis=-1, keepdims=True)
    o_ref[0] = e * pl.reciprocal(s, approx=True)      # (1, 10)


# ------------------------- weight packing (one-time) ------------------------

def pack_params(params):
    """Pre-pack PyTorch-layout params into kernel layouts (done once, eagerly)."""
    w1, b1, w2, b2, wfc, bfc = [np.asarray(p, np.float32) for p in params]

    # conv1: rows = padded-input lane w_in (0..27); cols = (w%2)*128 + (w//2)*8 + co
    W1p = np.zeros((3, 28, 256), np.float32)
    b1r = np.zeros((1, 256), np.float32)
    for w_out in range(28):
        col = (w_out % 2) * 128 + (w_out // 2) * 8
        b1r[0, col:col + 8] = b1
        for kh in range(3):
            for kw in range(3):
                w_in = w_out + kw - 1
                if 0 <= w_in < 28:
                    W1p[kh, w_in, col:col + 8] = w1[:, 0, kh, kw]

    # conv2: rows = pooled-1 lane (w2*8 + ci, 0..111; 112..127 dead -> zero)
    #        cols = (w%2)*128 + (w//2)*16 + co
    W2p = np.zeros((3, 128, 256), np.float32)
    b2r = np.zeros((1, 256), np.float32)
    for w_out in range(14):
        col = (w_out % 2) * 128 + (w_out // 2) * 16
        b2r[0, col:col + 16] = b2
        for kh in range(3):
            for kw in range(3):
                w_in = w_out + kw - 1
                if 0 <= w_in < 14:
                    W2p[kh, w_in * 8: w_in * 8 + 8, col:col + 16] = \
                        w2[:, :, kh, kw].T            # (ci, co)

    # fc: per spatial row h, rows = pooled-2 lane (w*16 + co), cols = class.
    # PyTorch flatten order of NCHW is  co*49 + h*7 + w.
    Wfcp = np.zeros((7, 128, 10), np.float32)
    wfc_r = wfc.reshape(10, 16, 7, 7)                 # (cls, co, h, w)
    for h in range(7):
        for w in range(7):
            Wfcp[h, w * 16: w * 16 + 16, :] = wfc_r[:, :, h, w].T   # (co, cls)
    bfcr = bfc.reshape(1, 10)

    return tuple(jnp.asarray(a) for a in (W1p, b1r, W2p, b2r, Wfcp, bfcr))


# ------------------------------ forward pass ---------------------------------

@jax.jit
def cnn_forward_pallas(x_nchw, packed):
    W1p, b1r, W2p, b2r, Wfcp, bfcr = packed
    bsz = x_nchw.shape[0]

    # Only wrapper-side prep: tiny H-padding of the raw input (W-padding and
    # channel handling are absorbed into the packed weights).
    xp = jnp.pad(x_nchw.reshape(bsz, 28, 28), ((0, 0), (1, 1), (0, 0)))

    out = pl.pallas_call(
        _cnn_kernel,
        out_shape=jax.ShapeDtypeStruct((bsz, 1, 10), jnp.float32),
        grid=(bsz,),
        in_specs=[
            pl.BlockSpec((1, 30, 28), lambda b: (b, 0, 0)),    # input sample
            pl.BlockSpec((3, 28, 256), lambda b: (0, 0, 0)),   # conv1 weights
            pl.BlockSpec((1, 256), lambda b: (0, 0)),          # conv1 bias row
            pl.BlockSpec((3, 128, 256), lambda b: (0, 0, 0)),  # conv2 weights
            pl.BlockSpec((1, 256), lambda b: (0, 0)),          # conv2 bias row
            pl.BlockSpec((7, 128, 10), lambda b: (0, 0, 0)),   # fc weights
            pl.BlockSpec((1, 10), lambda b: (0, 0)),           # fc bias
        ],
        out_specs=pl.BlockSpec((1, 1, 10), lambda b: (b, 0, 0)),
        scratch_shapes=[pltpu.VMEM((32, 128), jnp.float32)],   # dilated pool-1
        compiler_params=pltpu.CompilerParams(
            dimension_semantics=("parallel",)),
    )(xp, W1p, b1r, W2p, b2r, Wfcp, bfcr)
    return out.reshape(bsz, 10)


# --------------------------- pure-JAX reference ------------------------------

def cnn_forward_reference(x, params):
    w1, b1, w2, b2, wfc, bfc = params
    dn = ("NCHW", "OIHW", "NCHW")
    y = lax.conv_general_dilated(x, w1, (1, 1), ((1, 1), (1, 1)),
                                 dimension_numbers=dn)
    y = jax.nn.relu(y + b1[None, :, None, None])
    y = lax.reduce_window(y, -jnp.inf, lax.max, (1, 1, 2, 2), (1, 1, 2, 2), "VALID")
    y = lax.conv_general_dilated(y, w2, (1, 1), ((1, 1), (1, 1)),
                                 dimension_numbers=dn)
    y = jax.nn.relu(y + b2[None, :, None, None])
    y = lax.reduce_window(y, -jnp.inf, lax.max, (1, 1, 2, 2), (1, 1, 2, 2), "VALID")
    y = y.reshape(y.shape[0], -1)
    logits = y @ wfc.T + bfc
    return jax.nn.softmax(logits, axis=1)


# ---------------------------------- main -------------------------------------

if __name__ == "__main__":
    key = jax.random.PRNGKey(0)
    kx, k1, k2, k3, k4, k5, k6 = jax.random.split(key, 7)

    # Input implied by fc1 = Linear(16*7*7, 10): 28x28 spatial (two /2 pools).
    batch = 2
    x = jax.random.normal(kx, (batch, 1, 28, 28), jnp.float32)

    # Deterministic synthetic parameters (PyTorch layouts).
    w1 = jax.random.normal(k1, (8, 1, 3, 3), jnp.float32) * 0.2
    b1 = jax.random.normal(k2, (8,), jnp.float32) * 0.1
    w2 = jax.random.normal(k3, (16, 8, 3, 3), jnp.float32) * 0.1
    b2 = jax.random.normal(k4, (16,), jnp.float32) * 0.1
    wfc = jax.random.normal(k5, (10, 16 * 7 * 7), jnp.float32) * 0.05
    bfc = jax.random.normal(k6, (10,), jnp.float32) * 0.05
    params = (w1, b1, w2, b2, wfc, bfc)

    packed = pack_params(params)            # one-time, outside the jitted path

    out = jax.block_until_ready(cnn_forward_pallas(x, packed))
    ref = jax.block_until_ready(cnn_forward_reference(x, params))

    assert out.shape == (batch, 10)
    assert bool(jnp.all(jnp.isfinite(out)))
    assert jnp.allclose(jnp.sum(out, axis=1), 1.0, atol=1e-2)
    assert jnp.allclose(out, ref, atol=1e-2, rtol=1e-2), \
        float(jnp.max(jnp.abs(out - ref)))

    print("KERNEL_OK")
</pallas_src>

<mosaic_0001>
module attributes {stable_mosaic.version = 11 : i64} {
  func.func @_cnn_kernel(%arg0: i32, %arg1: memref<1x30x28xf32, #tpu.memory_space<vmem>>, %arg2: memref<3x28x256xf32, #tpu.memory_space<vmem>>, %arg3: memref<1x256xf32, #tpu.memory_space<vmem>>, %arg4: memref<3x128x256xf32, #tpu.memory_space<vmem>>, %arg5: memref<1x256xf32, #tpu.memory_space<vmem>>, %arg6: memref<7x128x10xf32, #tpu.memory_space<vmem>>, %arg7: memref<1x10xf32, #tpu.memory_space<vmem>>, %arg8: memref<1x1x10xf32, #tpu.memory_space<vmem>>, %arg9: memref<32x128xf32, #tpu.memory_space<vmem>>) attributes {dimension_semantics = [#tpu.dimension_semantics<parallel>], iteration_bounds = array<i64: 2>, scalar_prefetch = 0 : i64, scratch_operands = 1 : i64, tpu.core_type = #tpu.core_type<tc>, window_params = [{transform_indices = @transform_0, window_bounds = array<i64: 1, 30, 28>}, {pipeline_mode = #tpu.pipeline_mode<synchronous>, transform_indices = @transform_1, window_bounds = array<i64: 3, 28, 256>}, {pipeline_mode = #tpu.pipeline_mode<synchronous>, transform_indices = @transform_2, window_bounds = array<i64: 1, 256>}, {pipeline_mode = #tpu.pipeline_mode<synchronous>, transform_indices = @transform_3, window_bounds = array<i64: 3, 128, 256>}, {pipeline_mode = #tpu.pipeline_mode<synchronous>, transform_indices = @transform_4, window_bounds = array<i64: 1, 256>}, {pipeline_mode = #tpu.pipeline_mode<synchronous>, transform_indices = @transform_5, window_bounds = array<i64: 7, 128, 10>}, {pipeline_mode = #tpu.pipeline_mode<synchronous>, transform_indices = @transform_6, window_bounds = array<i64: 1, 10>}, {transform_indices = @transform_7, window_bounds = array<i64: 1, 1, 10>}]} {
    %c0 = arith.constant 0 : index
    %c0_0 = arith.constant 0 : index
    %c0_1 = arith.constant 0 : index
    %0 = vector.load %arg1[%c0, %c0_0, %c0_1] : memref<1x30x28xf32, #tpu.memory_space<vmem>>, vector<1x30x28xf32>
    %1 = vector.shape_cast %0 : vector<1x30x28xf32> to vector<30x28xf32>
    %cst = arith.constant 0.000000e+00 : f32
    %2 = vector.broadcast %cst : f32 to vector<28x256xf32>
    %3 = vector.extract_strided_slice %1 {offsets = [0, 0], sizes = [28, 28], strides = [1, 1]} : vector<30x28xf32> to vector<28x28xf32>
    %c0_2 = arith.constant 0 : index
    %c0_3 = arith.constant 0 : index
    %c0_4 = arith.constant 0 : index
    %4 = vector.load %arg2[%c0_2, %c0_3, %c0_4] : memref<3x28x256xf32, #tpu.memory_space<vmem>>, vector<1x28x256xf32>
    %5 = vector.shape_cast %4 : vector<1x28x256xf32> to vector<28x256xf32>
    %cst_5 = arith.constant dense<0.000000e+00> : vector<28x256xf32>
    %6 = tpu.matmul %3, %5, %cst_5 {dimension_numbers = #tpu.dot_dimension_numbers<[1], [0], [0], [1], [0, 0, 1, 1], [], []>} : vector<28x28xf32>, vector<28x256xf32>, vector<28x256xf32> -> vector<28x256xf32>
    %7 = arith.addf %2, %6 : vector<28x256xf32>
    %8 = vector.extract_strided_slice %1 {offsets = [1, 0], sizes = [28, 28], strides = [1, 1]} : vector<30x28xf32> to vector<28x28xf32>
    %c1 = arith.constant 1 : index
    %c0_6 = arith.constant 0 : index
    %c0_7 = arith.constant 0 : index
    %9 = vector.load %arg2[%c1, %c0_6, %c0_7] : memref<3x28x256xf32, #tpu.memory_space<vmem>>, vector<1x28x256xf32>
    %10 = vector.shape_cast %9 : vector<1x28x256xf32> to vector<28x256xf32>
    %cst_8 = arith.constant dense<0.000000e+00> : vector<28x256xf32>
    %11 = tpu.matmul %8, %10, %cst_8 {dimension_numbers = #tpu.dot_dimension_numbers<[1], [0], [0], [1], [0, 0, 1, 1], [], []>} : vector<28x28xf32>, vector<28x256xf32>, vector<28x256xf32> -> vector<28x256xf32>
    %12 = arith.addf %7, %11 : vector<28x256xf32>
    %13 = vector.extract_strided_slice %1 {offsets = [2, 0], sizes = [28, 28], strides = [1, 1]} : vector<30x28xf32> to vector<28x28xf32>
    %c2 = arith.constant 2 : index
    %c0_9 = arith.constant 0 : index
    %c0_10 = arith.constant 0 : index
    %14 = vector.load %arg2[%c2, %c0_9, %c0_10] : memref<3x28x256xf32, #tpu.memory_space<vmem>>, vector<1x28x256xf32>
    %15 = vector.shape_cast %14 : vector<1x28x256xf32> to vector<28x256xf32>
    %cst_11 = arith.constant dense<0.000000e+00> : vector<28x256xf32>
    %16 = tpu.matmul %13, %15, %cst_11 {dimension_numbers = #tpu.dot_dimension_numbers<[1], [0], [0], [1], [0, 0, 1, 1], [], []>} : vector<28x28xf32>, vector<28x256xf32>, vector<28x256xf32> -> vector<28x256xf32>
    %17 = arith.addf %12, %16 : vector<28x256xf32>
    %c0_12 = arith.constant 0 : index
    %c0_13 = arith.constant 0 : index
    %18 = vector.load %arg3[%c0_12, %c0_13] : memref<1x256xf32, #tpu.memory_space<vmem>>, vector<1x256xf32>
    %19 = vector.broadcast %18 : vector<1x256xf32> to vector<28x256xf32>
    %20 = arith.addf %17, %19 : vector<28x256xf32>
    %cst_14 = arith.constant 0.000000e+00 : f32
    %21 = vector.broadcast %cst_14 : f32 to vector<28x256xf32>
    %22 = arith.maximumf %20, %21 : vector<28x256xf32>
    %23 = vector.extract_strided_slice %22 {offsets = [0, 0], sizes = [27, 256], strides = [1, 1]} : vector<28x256xf32> to vector<27x256xf32>
    %24 = vector.extract_strided_slice %22 {offsets = [1, 0], sizes = [27, 256], strides = [1, 1]} : vector<28x256xf32> to vector<27x256xf32>
    %25 = arith.maximumf %23, %24 : vector<27x256xf32>
    %26 = vector.extract_strided_slice %25 {offsets = [0, 0], sizes = [27, 128], strides = [1, 1]} : vector<27x256xf32> to vector<27x128xf32>
    %27 = vector.extract_strided_slice %25 {offsets = [0, 128], sizes = [27, 128], strides = [1, 1]} : vector<27x256xf32> to vector<27x128xf32>
    %28 = arith.maximumf %26, %27 : vector<27x128xf32>
    %cst_15 = arith.constant 0.000000e+00 : f32
    %29 = vector.broadcast %cst_15 : f32 to vector<32x128xf32>
    %c0_16 = arith.constant 0 : index
    %c0_17 = arith.constant 0 : index
    %30 = vector.load %arg9[%c0_16, %c0_17] : memref<32x128xf32, #tpu.memory_space<vmem>>, vector<32x128xf32>
    tpu.vector_store %arg9[%c0_16, %c0_17], %29 {strides = array<i32>} : memref<32x128xf32, #tpu.memory_space<vmem>>, vector<32x128xf32>,
    %c2_18 = arith.constant 2 : index
    %c0_19 = arith.constant 0 : index
    %31 = vector.load %arg9[%c2_18, %c0_19] : memref<32x128xf32, #tpu.memory_space<vmem>>, vector<27x128xf32>
    tpu.vector_store %arg9[%c2_18, %c0_19], %28 {strides = array<i32>} : memref<32x128xf32, #tpu.memory_space<vmem>>, vector<27x128xf32>,
    %cst_20 = arith.constant 0.000000e+00 : f32
    %32 = vector.broadcast %cst_20 : f32 to vector<27x256xf32>
    %c0_21 = arith.constant 0 : index
    %c0_22 = arith.constant 0 : index
    %33 = vector.load %arg9[%c0_21, %c0_22] : memref<32x128xf32, #tpu.memory_space<vmem>>, vector<27x128xf32>
    %c0_23 = arith.constant 0 : index
    %c0_24 = arith.constant 0 : index
    %c0_25 = arith.constant 0 : index
    %34 = vector.load %arg4[%c0_23, %c0_24, %c0_25] : memref<3x128x256xf32, #tpu.memory_space<vmem>>, vector<1x128x256xf32>
    %35 = vector.shape_cast %34 : vector<1x128x256xf32> to vector<128x256xf32>
    %cst_26 = arith.constant dense<0.000000e+00> : vector<27x256xf32>
    %36 = tpu.matmul %33, %35, %cst_26 {dimension_numbers = #tpu.dot_dimension_numbers<[1], [0], [0], [1], [0, 0, 1, 1], [], []>} : vector<27x128xf32>, vector<128x256xf32>, vector<27x256xf32> -> vector<27x256xf32>
    %37 = arith.addf %32, %36 : vector<27x256xf32>
    %c2_27 = arith.constant 2 : index
    %c0_28 = arith.constant 0 : index
    %38 = vector.load %arg9[%c2_27, %c0_28] : memref<32x128xf32, #tpu.memory_space<vmem>>, vector<27x128xf32>
    %c1_29 = arith.constant 1 : index
    %c0_30 = arith.constant 0 : index
    %c0_31 = arith.constant 0 : index
    %39 = vector.load %arg4[%c1_29, %c0_30, %c0_31] : memref<3x128x256xf32, #tpu.memory_space<vmem>>, vector<1x128x256xf32>
    %40 = vector.shape_cast %39 : vector<1x128x256xf32> to vector<128x256xf32>
    %cst_32 = arith.constant dense<0.000000e+00> : vector<27x256xf32>
    %41 = tpu.matmul %38, %40, %cst_32 {dimension_numbers = #tpu.dot_dimension_numbers<[1], [0], [0], [1], [0, 0, 1, 1], [], []>} : vector<27x128xf32>, vector<128x256xf32>, vector<27x256xf32> -> vector<27x256xf32>
    %42 = arith.addf %37, %41 : vector<27x256xf32>
    %c4 = arith.constant 4 : index
    %c0_33 = arith.constant 0 : index
    %43 = vector.load %arg9[%c4, %c0_33] : memref<32x128xf32, #tpu.memory_space<vmem>>, vector<27x128xf32>
    %c2_34 = arith.constant 2 : index
    %c0_35 = arith.constant 0 : index
    %c0_36 = arith.constant 0 : index
    %44 = vector.load %arg4[%c2_34, %c0_35, %c0_36] : memref<3x128x256xf32, #tpu.memory_space<vmem>>, vector<1x128x256xf32>
    %45 = vector.shape_cast %44 : vector<1x128x256xf32> to vector<128x256xf32>
    %cst_37 = arith.constant dense<0.000000e+00> : vector<27x256xf32>
    %46 = tpu.matmul %43, %45, %cst_37 {dimension_numbers = #tpu.dot_dimension_numbers<[1], [0], [0], [1], [0, 0, 1, 1], [], []>} : vector<27x128xf32>, vector<128x256xf32>, vector<27x256xf32> -> vector<27x256xf32>
    %47 = arith.addf %42, %46 : vector<27x256xf32>
    %c0_38 = arith.constant 0 : index
    %c0_39 = arith.constant 0 : index
    %48 = vector.load %arg5[%c0_38, %c0_39] : memref<1x256xf32, #tpu.memory_space<vmem>>, vector<1x256xf32>
    %49 = vector.broadcast %48 : vector<1x256xf32> to vector<27x256xf32>
    %50 = arith.addf %47, %49 : vector<27x256xf32>
    %cst_40 = arith.constant 0.000000e+00 : f32
    %51 = vector.broadcast %cst_40 : f32 to vector<27x256xf32>
    %52 = arith.maximumf %50, %51 : vector<27x256xf32>
    %53 = vector.extract_strided_slice %52 {offsets = [0, 0], sizes = [25, 256], strides = [1, 1]} : vector<27x256xf32> to vector<25x256xf32>
    %54 = vector.extract_strided_slice %52 {offsets = [2, 0], sizes = [25, 256], strides = [1, 1]} : vector<27x256xf32> to vector<25x256xf32>
    %55 = arith.maximumf %53, %54 : vector<25x256xf32>
    %56 = vector.extract_strided_slice %55 {offsets = [0, 0], sizes = [25, 128], strides = [1, 1]} : vector<25x256xf32> to vector<25x128xf32>
    %57 = vector.extract_strided_slice %55 {offsets = [0, 128], sizes = [25, 128], strides = [1, 1]} : vector<25x256xf32> to vector<25x128xf32>
    %58 = arith.maximumf %56, %57 : vector<25x128xf32>
    %c0_41 = arith.constant 0 : index
    %c0_42 = arith.constant 0 : index
    %59 = vector.load %arg7[%c0_41, %c0_42] : memref<1x10xf32, #tpu.memory_space<vmem>>, vector<1x10xf32>
    %60 = vector.extract_strided_slice %58 {offsets = [0, 0], sizes = [1, 128], strides = [1, 1]} : vector<25x128xf32> to vector<1x128xf32>
    %c0_43 = arith.constant 0 : index
    %c0_44 = arith.constant 0 : index
    %c0_45 = arith.constant 0 : index
    %61 = vector.load %arg6[%c0_43, %c0_44, %c0_45] : memref<7x128x10xf32, #tpu.memory_space<vmem>>, vector<1x128x10xf32>
    %62 = vector.shape_cast %61 : vector<1x128x10xf32> to vector<128x10xf32>
    %cst_46 = arith.constant dense<0.000000e+00> : vector<1x10xf32>
    %63 = tpu.matmul %60, %62, %cst_46 {dimension_numbers = #tpu.dot_dimension_numbers<[1], [0], [0], [1], [0, 0, 1, 1], [], []>} : vector<1x128xf32>, vector<128x10xf32>, vector<1x10xf32> -> vector<1x10xf32>
    %64 = arith.addf %59, %63 : vector<1x10xf32>
    %65 = vector.extract_strided_slice %58 {offsets = [4, 0], sizes = [1, 128], strides = [1, 1]} : vector<25x128xf32> to vector<1x128xf32>
    %c1_47 = arith.constant 1 : index
    %c0_48 = arith.constant 0 : index
    %c0_49 = arith.constant 0 : index
    %66 = vector.load %arg6[%c1_47, %c0_48, %c0_49] : memref<7x128x10xf32, #tpu.memory_space<vmem>>, vector<1x128x10xf32>
    %67 = vector.shape_cast %66 : vector<1x128x10xf32> to vector<128x10xf32>
    %cst_50 = arith.constant dense<0.000000e+00> : vector<1x10xf32>
    %68 = tpu.matmul %65, %67, %cst_50 {dimension_numbers = #tpu.dot_dimension_numbers<[1], [0], [0], [1], [0, 0, 1, 1], [], []>} : vector<1x128xf32>, vector<128x10xf32>, vector<1x10xf32> -> vector<1x10xf32>
    %69 = arith.addf %64, %68 : vector<1x10xf32>
    %70 = vector.extract_strided_slice %58 {offsets = [8, 0], sizes = [1, 128], strides = [1, 1]} : vector<25x128xf32> to vector<1x128xf32>
    %c2_51 = arith.constant 2 : index
    %c0_52 = arith.constant 0 : index
    %c0_53 = arith.constant 0 : index
    %71 = vector.load %arg6[%c2_51, %c0_52, %c0_53] : memref<7x128x10xf32, #tpu.memory_space<vmem>>, vector<1x128x10xf32>
    %72 = vector.shape_cast %71 : vector<1x128x10xf32> to vector<128x10xf32>
    %cst_54 = arith.constant dense<0.000000e+00> : vector<1x10xf32>
    %73 = tpu.matmul %70, %72, %cst_54 {dimension_numbers = #tpu.dot_dimension_numbers<[1], [0], [0], [1], [0, 0, 1, 1], [], []>} : vector<1x128xf32>, vector<128x10xf32>, vector<1x10xf32> -> vector<1x10xf32>
    %74 = arith.addf %69, %73 : vector<1x10xf32>
    %75 = vector.extract_strided_slice %58 {offsets = [12, 0], sizes = [1, 128], strides = [1, 1]} : vector<25x128xf32> to vector<1x128xf32>
    %c3 = arith.constant 3 : index
    %c0_55 = arith.constant 0 : index
    %c0_56 = arith.constant 0 : index
    %76 = vector.load %arg6[%c3, %c0_55, %c0_56] : memref<7x128x10xf32, #tpu.memory_space<vmem>>, vector<1x128x10xf32>
    %77 = vector.shape_cast %76 : vector<1x128x10xf32> to vector<128x10xf32>
    %cst_57 = arith.constant dense<0.000000e+00> : vector<1x10xf32>
    %78 = tpu.matmul %75, %77, %cst_57 {dimension_numbers = #tpu.dot_dimension_numbers<[1], [0], [0], [1], [0, 0, 1, 1], [], []>} : vector<1x128xf32>, vector<128x10xf32>, vector<1x10xf32> -> vector<1x10xf32>
    %79 = arith.addf %74, %78 : vector<1x10xf32>
    %80 = vector.extract_strided_slice %58 {offsets = [16, 0], sizes = [1, 128], strides = [1, 1]} : vector<25x128xf32> to vector<1x128xf32>
    %c4_58 = arith.constant 4 : index
    %c0_59 = arith.constant 0 : index
    %c0_60 = arith.constant 0 : index
    %81 = vector.load %arg6[%c4_58, %c0_59, %c0_60] : memref<7x128x10xf32, #tpu.memory_space<vmem>>, vector<1x128x10xf32>
    %82 = vector.shape_cast %81 : vector<1x128x10xf32> to vector<128x10xf32>
    %cst_61 = arith.constant dense<0.000000e+00> : vector<1x10xf32>
    %83 = tpu.matmul %80, %82, %cst_61 {dimension_numbers = #tpu.dot_dimension_numbers<[1], [0], [0], [1], [0, 0, 1, 1], [], []>} : vector<1x128xf32>, vector<128x10xf32>, vector<1x10xf32> -> vector<1x10xf32>
    %84 = arith.addf %79, %83 : vector<1x10xf32>
    %85 = vector.extract_strided_slice %58 {offsets = [20, 0], sizes = [1, 128], strides = [1, 1]} : vector<25x128xf32> to vector<1x128xf32>
    %c5 = arith.constant 5 : index
    %c0_62 = arith.constant 0 : index
    %c0_63 = arith.constant 0 : index
    %86 = vector.load %arg6[%c5, %c0_62, %c0_63] : memref<7x128x10xf32, #tpu.memory_space<vmem>>, vector<1x128x10xf32>
    %87 = vector.shape_cast %86 : vector<1x128x10xf32> to vector<128x10xf32>
    %cst_64 = arith.constant dense<0.000000e+00> : vector<1x10xf32>
    %88 = tpu.matmul %85, %87, %cst_64 {dimension_numbers = #tpu.dot_dimension_numbers<[1], [0], [0], [1], [0, 0, 1, 1], [], []>} : vector<1x128xf32>, vector<128x10xf32>, vector<1x10xf32> -> vector<1x10xf32>
    %89 = arith.addf %84, %88 : vector<1x10xf32>
    %90 = vector.extract_strided_slice %58 {offsets = [24, 0], sizes = [1, 128], strides = [1, 1]} : vector<25x128xf32> to vector<1x128xf32>
    %c6 = arith.constant 6 : index
    %c0_65 = arith.constant 0 : index
    %c0_66 = arith.constant 0 : index
    %91 = vector.load %arg6[%c6, %c0_65, %c0_66] : memref<7x128x10xf32, #tpu.memory_space<vmem>>, vector<1x128x10xf32>
    %92 = vector.shape_cast %91 : vector<1x128x10xf32> to vector<128x10xf32>
    %cst_67 = arith.constant dense<0.000000e+00> : vector<1x10xf32>
    %93 = tpu.matmul %90, %92, %cst_67 {dimension_numbers = #tpu.dot_dimension_numbers<[1], [0], [0], [1], [0, 0, 1, 1], [], []>} : vector<1x128xf32>, vector<128x10xf32>, vector<1x10xf32> -> vector<1x10xf32>
    %94 = arith.addf %89, %93 : vector<1x10xf32>
    %cst_68 = arith.constant dense<0xFF800000> : vector<1xf32>
    %95 = vector.multi_reduction <maximumf>, %94, %cst_68 [1] : vector<1x10xf32> to vector<1xf32>
    %96 = vector.shape_cast %95 : vector<1xf32> to vector<1x1xf32>
    %97 = vector.broadcast %96 : vector<1x1xf32> to vector<1x10xf32>
    %98 = arith.subf %94, %97 : vector<1x10xf32>
    %99 = math.exp %98 : vector<1x10xf32>
    %cst_69 = arith.constant dense<0.000000e+00> : vector<1xf32>
    %100 = vector.multi_reduction <add>, %99, %cst_69 [1] : vector<1x10xf32> to vector<1xf32>
    %101 = vector.shape_cast %100 : vector<1xf32> to vector<1x1xf32>
    %102 = tpu.reciprocal %101 {approx = true} : vector<1x1xf32> -> vector<1x1xf32>
    %103 = vector.broadcast %102 : vector<1x1xf32> to vector<1x10xf32>
    %104 = arith.mulf %99, %103 : vector<1x10xf32>
    %c0_70 = arith.constant 0 : index
    %c0_71 = arith.constant 0 : index
    %c0_72 = arith.constant 0 : index
    %105 = vector.load %arg8[%c0_70, %c0_71, %c0_72] : memref<1x1x10xf32, #tpu.memory_space<vmem>>, vector<1x1x10xf32>
    %106 = vector.shape_cast %105 : vector<1x1x10xf32> to vector<1x10xf32>
    %107 = vector.shape_cast %104 : vector<1x10xf32> to vector<1x1x10xf32>
    tpu.vector_store %arg8[%c0_70, %c0_71, %c0_72], %107 {strides = array<i32>} : memref<1x1x10xf32, #tpu.memory_space<vmem>>, vector<1x1x10xf32>,
    return
  }
  func.func @transform_0(%arg0: i32) -> (i32, i32, i32) {
    %c0_i32 = arith.constant 0 : i32
    %c0_i32_0 = arith.constant 0 : i32
    %c0_i32_1 = arith.constant 0 : i32
    return %arg0, %c0_i32, %c0_i32_0 : i32, i32, i32
  }
  func.func @transform_1(%arg0: i32) -> (i32, i32, i32) {
    %c0_i32 = arith.constant 0 : i32
    %c0_i32_0 = arith.constant 0 : i32
    %c0_i32_1 = arith.constant 0 : i32
    %c0_i32_2 = arith.constant 0 : i32
    return %c0_i32, %c0_i32_0, %c0_i32_1 : i32, i32, i32
  }
  func.func @transform_2(%arg0: i32) -> (i32, i32) {
    %c0_i32 = arith.constant 0 : i32
    %c0_i32_0 = arith.constant 0 : i32
    %c0_i32_1 = arith.constant 0 : i32
    return %c0_i32, %c0_i32_0 : i32, i32
  }
  func.func @transform_3(%arg0: i32) -> (i32, i32, i32) {
    %c0_i32 = arith.constant 0 : i32
    %c0_i32_0 = arith.constant 0 : i32
    %c0_i32_1 = arith.constant 0 : i32
    %c0_i32_2 = arith.constant 0 : i32
    return %c0_i32, %c0_i32_0, %c0_i32_1 : i32, i32, i32
  }
  func.func @transform_4(%arg0: i32) -> (i32, i32) {
    %c0_i32 = arith.constant 0 : i32
    %c0_i32_0 = arith.constant 0 : i32
    %c0_i32_1 = arith.constant 0 : i32
    return %c0_i32, %c0_i32_0 : i32, i32
  }
  func.func @transform_5(%arg0: i32) -> (i32, i32, i32) {
    %c0_i32 = arith.constant 0 : i32
    %c0_i32_0 = arith.constant 0 : i32
    %c0_i32_1 = arith.constant 0 : i32
    %c0_i32_2 = arith.constant 0 : i32
    return %c0_i32, %c0_i32_0, %c0_i32_1 : i32, i32, i32
  }
  func.func @transform_6(%arg0: i32) -> (i32, i32) {
    %c0_i32 = arith.constant 0 : i32
    %c0_i32_0 = arith.constant 0 : i32
    %c0_i32_1 = arith.constant 0 : i32
    return %c0_i32, %c0_i32_0 : i32, i32
  }
  func.func @transform_7(%arg0: i32) -> (i32, i32, i32) {
    %c0_i32 = arith.constant 0 : i32
    %c0_i32_0 = arith.constant 0 : i32
    %c0_i32_1 = arith.constant 0 : i32
    return %arg0, %c0_i32, %c0_i32_0 : i32, i32, i32
  }
}

</mosaic_0001>

<bundles_post_ra>
// kernel: cnn_forward_pallas.1
= control target key start
LH: loop header
LB: loop body
LE: loop exit
PB: predicated region body
PF: predicated region fallthrough
CT: control target
= control target key end

     0   :  { %12 = vsyncpa [#allocation4], 0  ;;  %s3948_s0 = inlined_call_operand.vmem [shape: f32[2,30,28], index: 0, kind: input, shape index: {}]   ;;  %s3949_s1 = inlined_call_operand.vmem [shape: f32[3,28,256], index: 1, kind: input, shape index: {}]   ;;  %s3950_s2 = inlined_call_operand.vmem [shape: f32[1,256], index: 2, kind: input, shape index: {}]   ;;  %s3951_s3 = inlined_call_operand.vmem [shape: f32[3,128,256], index: 3, kind: input, shape index: {}]   ;;  %s3952_s4 = inlined_call_operand.vmem [shape: f32[1,256], index: 4, kind: input, shape index: {}]   ;;  %s3953_s5 = inlined_call_operand.vmem [shape: f32[7,128,10], index: 5, kind: input, shape index: {}]   ;;  %s3954_s6 = inlined_call_operand.vmem [shape: f32[1,10], index: 6, kind: input, shape index: {}]   ;;  %s3955_s7 = inlined_call_operand.hbm [shape: f32[2,1,10], index: 7, kind: output, shape index: {}]  }
   0x1   :  { %14 = vsyncpa [#allocation4 + $0x1], 0  ;;  %s2946_s24 = smov 0   ;;  %s2948_s25 = smov 0  }
   0x2   :  { %s2950_s26 = smov 0   ;;  %s2952_s27 = smov 0  }
   0x3 LB: > { %s2967_s28 = sadd.s32 4294967295, %s2899_s27   ;;  %s1884_s29 = sadd.s32 4294967294, %s2899_s27   ;;  %s2899_s27 = sphi %s2952_s27, %s3963_s27   ;;  %s2895_s26 = sphi %s2950_s26, %s3962_s26   ;;  %s2891_s25 = sphi %s2948_s25, %s3961_s25   ;;  %s2887_s24 = sphi %s2946_s24, %s3960_s24  }
   0x4   : > { %s2971_s30 = sadd.s32 1, %s2899_s27   ;;  %s179_s8 = sadd.s32 1, %s2895_s26 }
   0x5   : > { %s176_s9 = ssub.s32 %s2899_s27, %s2971_s30  ;;  %p189_p0 = scmp.ne.s32.totalorder %s2895_s26, %s2891_s25 }
   0x6   : > { %p177_p1 = scmp.eq.s32.totalorder %s176_s9, 0  ;;  %p190_p2 = scmp.eq.s32.totalorder %s2967_s28, 1 }
   0x7   : > { %p195_p3 = scmp.ne.s32.totalorder %s2891_s25, %s2887_s24  ;;  %p196_p4 = scmp.eq.s32.totalorder %s1884_s29, 1 }
   0x8   : > { %s2982_s10 = scalar_select %p177_p1, %s2895_s26, %s179_s8  }
   0x9   : > { %p2984_p5 = por %p190_p2, %p189_p0  ;;  %p2988_p6 = por %p196_p4, %p195_p3 }
   0xa   : > { %p1887_p7 = scmp.ge.s32.totalorder %s2899_s27, 1  ;;  %p240_p8 = scmp.lt.s32.totalorder %s2899_s27, 3 }
   0xc   : > { %p241_p9 = pnand %p1887_p7, %p240_p8 }
   0xd   : > { %v281_v0 = vld [vmem:[%s3949_s1 + $0x8] sm:$0xff] (!%p241_p9)  ;;  %v283_v1 = vld [vmem:[%s3949_s1 + $0x18] sm:$0xff] (!%p241_p9)  ;;  %v280_v2 = vld [vmem:[%s3949_s1] sm:$0xff] (!%p241_p9)  ;;  %vm318_vm0 = vcmask (!%p241_p9), 1043456   ;;  %v2901_v7 = vmov (!%p241_p9), 0.0   ;;  %p271_p10 = scmp.lt.s32.totalorder (!%p241_p9), %s2967_s28, 1 }
   0xe   : > { %244 = sbr.rel (%p241_p9) target bundleno = 1238 (0x4d6), region = 48  ;;  %v2462_v3 = vpack.c.bf16 (!%p241_p9), %v283_v1, %v281_v0  ;;  %v282_v4 = vld [vmem:[%s3949_s1 + $0x10] sm:$0xff] (!%p241_p9)  ;;  %v285_v5 = vld [vmem:[%s3949_s1 + $0x28] sm:$0xff] (!%p241_p9)  ;;  %v287_v6 = vld [vmem:[%s3949_s1 + $0x38] sm:$0xf] (!%p241_p9)  ;;  %492 = vmatprep.mubr.f32.mxu0 (!%p241_p9), %v2901_v7  ;;  %715 = vst [vmem:[#allocation2] sm:$0xff] (!%p241_p9), %v2901_v7  ;;  %389 = vmatprep.mubr.f32.mxu1 (!%p241_p9), %v2901_v7 }
   0xf   : > { %716 = vst [vmem:[#allocation2 + $0x8] sm:$0xff] (!%p241_p9), %v2901_v7  ;;  %717 = vst [vmem:[#allocation2 + $0x10] sm:$0xff] (!%p241_p9), %v2901_v7  ;;  %v2464_v8 = vpack.c.bf16 (!%p241_p9), %v282_v4, %v280_v2  ;;  %vm2902_vm1 = vmmov (!%p241_p9), 1   ;;  %v2466_v10 = vpack.c.bf16 (!%p241_p9), %v287_v6, %v285_v5  ;;  %v284_v11 = vld [vmem:[%s3949_s1 + $0x20] sm:$0xff] (!%p241_p9)  ;;  %v286_v12 = vld [vmem:[%s3949_s1 + $0x30] sm:$0xf] (!%p241_p9) }
  0x10   : > { %718 = vst [vmem:[#allocation2 + $0x18] sm:$0xff] (!%p241_p9), %v2901_v7  ;;  %vm3020_vm2 = vmpackc.low (!%p241_p9), %vm318_vm0, %vm2902_vm1  ;;  %2463 = vmatprep.subr.bf16.mxu0 (!%p241_p9), %v2462_v3  ;;  %v1911_v13 = vld [vmem:[%s3949_s1 + $0x88] sm:$0xff] (!%p241_p9)  ;;  %v1913_v14 = vld [vmem:[%s3949_s1 + $0x98] sm:$0xff] (!%p241_p9)  ;;  %v2469_v15 = vpack.c.bf16 (!%p241_p9), %v286_v12, %v284_v11  ;;  %vm309_vm3 = vcmask (!%p241_p9), 228352   ;;  %vm301_vm4 = vcmask (!%p241_p9), 1046528   ;;  %vm526_vm5 = vcmask (!%p241_p9), 1045504  }
  0x11   : > { %2465 = vmatpush1.bf16.msra.mxu0 (!%p241_p9), %v2464_v8  ;;  %v1891_v16 = vld [vmem:[%s3949_s1 + $0x48] sm:$0xff] (!%p241_p9)  ;;  %v1893_v17 = vld [vmem:[%s3949_s1 + $0x58] sm:$0xff] (!%p241_p9)  ;;  %v2472_v18 = vpack.c.bf16 (!%p241_p9), %v1913_v14, %v1911_v13  ;;  %v1910_v19 = vld [vmem:[%s3949_s1 + $0x80] sm:$0xff] (!%p241_p9)  ;;  %vm2904_vm6 = vmmov (!%p241_p9), 0   ;;  %vm1803_vm7 = vcmask (!%p241_p9), 73728  }
  0x12   : > { %2468 = vmatprep.subr.msk.bf16.mxu0 (!%p241_p9), %vm3020_vm2, %v2466_v10  ;;  %v1912_v20 = vld [vmem:[%s3949_s1 + $0x90] sm:$0xff] (!%p241_p9)  ;;  %v2452_v21 = vpack.c.bf16 (!%p241_p9), %v1893_v17, %v1891_v16  ;;  %v1890_v22 = vld [vmem:[%s3949_s1 + $0x40] sm:$0xff] (!%p241_p9)  ;;  %v1915_v23 = vld [vmem:[%s3949_s1 + $0xa8] sm:$0xff] (!%p241_p9) }
  0x13   : > { %v1917_v24 = vld [vmem:[%s3949_s1 + $0xb8] sm:$0xf] (!%p241_p9)  ;;  %v1892_v25 = vld [vmem:[%s3949_s1 + $0x50] sm:$0xff] (!%p241_p9)  ;;  %v1914_v27 = vld [vmem:[%s3949_s1 + $0xa0] sm:$0xff] (!%p241_p9)  ;;  %v2474_v29 = vpack.c.bf16 (!%p241_p9), %v1912_v20, %v1910_v19 }
  0x14   : > { %2453 = vmatprep.subr.bf16.mxu1 (!%p241_p9), %v2452_v21  ;;  %v2454_v26 = vpack.c.bf16 (!%p241_p9), %v1892_v25, %v1890_v22  ;;  %v1895_v30 = vld [vmem:[%s3949_s1 + $0x68] sm:$0xff] (!%p241_p9)  ;;  %v1894_v31 = vld [vmem:[%s3949_s1 + $0x60] sm:$0xff] (!%p241_p9)  ;;  %v2476_v33 = vpack.c.bf16 (!%p241_p9), %v1917_v24, %v1915_v23  ;;  %v1916_v34 = vld [vmem:[%s3949_s1 + $0xb0] sm:$0xf] (!%p241_p9) }
  0x15   : > { %s272_s15 = scalar_select %p271_p10, %s2967_s28, 1  ;;  %2471 = vmatpush1.bf16.msk.msra.mxu0 %vm3020_vm2, %v2469_v15  ;;  %v1897_v35 = vld [vmem:[%s3949_s1 + $0x78] sm:$0xf]  ;;  %v1896_v39 = vld [vmem:[%s3949_s1 + $0x70] sm:$0xf]  ;;  %v1925_v40 = vld [vmem:[%s3951_s3 + $0x108] sm:$0xff]  ;;  %v2479_v45 = vpack.c.bf16 %v1916_v34, %v1914_v27 }
  0x16   : > { %2473 = vmatprep.subr.bf16.mxu0 %v2472_v18  ;;  %2455 = vmatpush1.bf16.msra.mxu1 %v2454_v26  ;;  %v2456_v38 = vpack.c.bf16 %v1897_v35, %v1895_v30  ;;  %v1927_v41 = vld [vmem:[%s3951_s3 + $0x118] sm:$0xff]  ;;  %v2459_v42 = vpack.c.bf16 %v1896_v39, %v1894_v31  ;;  %v1924_v43 = vld [vmem:[%s3951_s3 + $0x100] sm:$0xff]  ;;  %v1926_v44 = vld [vmem:[%s3951_s3 + $0x110] sm:$0xff] }
  0x17   : > { %s2087_s29 = sshll.u32 %s272_s15, 5  ;;  %v2482_v46 = vpack.c.bf16 %v1927_v41, %v1925_v40  ;;  %v1929_v47 = vld [vmem:[%s3951_s3 + $0x128] sm:$0xff]  ;;  %v1931_v48 = vld [vmem:[%s3951_s3 + $0x138] sm:$0xff]  ;;  %v2484_v52 = vpack.c.bf16 %v1926_v44, %v1924_v43  ;;  %v1928_v54 = vld [vmem:[%s3951_s3 + $0x120] sm:$0xff]  ;;  %v2903_v44 = vmov 0.0|0.0  }
  0x18   : > { %s3057_s20 = scalar_lea.vmem %s3948_s0, %s2087_s29  ;;  %2458 = vmatprep.subr.msk.bf16.mxu1 %vm3020_vm2, %v2456_v38  ;;  %v2486_v53 = vpack.c.bf16 %v1931_v48, %v1929_v47  ;;  %v1930_v55 = vld [vmem:[%s3951_s3 + $0x130] sm:$0xff]  ;;  %v1933_v4 = vld [vmem:[%s3951_s3 + $0x148] sm:$0xff]  ;;  %v1935_v5 = vld [vmem:[%s3951_s3 + $0x158] sm:$0xff]  ;;  %s2084_s29 = sshll.u32 %s2967_s28, 4 }
  0x19   : > { %v3074_v28 = vld [vmem:[%s3057_s20] sm:$0xff]  ;;  %v3083_v32 = vld [vmem:[%s3057_s20 + $0x8] sm:$0xff]  ;;  %v278_v49 = vld [vmem:[%s3057_s20 + $0x10] sm:$0xff]  ;;  %v2488_v59 = vpack.c.bf16 %v1930_v55, %v1928_v54  ;;  %v2490_v6 = vpack.c.bf16 %v1935_v5, %v1933_v4  ;;  %v647_v54 = vlaneseq  ;;  %s3905_s15 = scalar_lea.hbm %s3955_s7, %s2084_s29  ;;  %s2905_s28 = smov [#allocation3]  }
  0x1a   : > { %v302_v36 = vrot.slane %v3074_v28, 1  ;;  %v303_v37 = vrot.slane %v3083_v32, 1  ;;  %1906 = vmatmul.mubr.msk.f32.vlgmr.msra.gmra.mrb[0].mxu0 %vm309_vm3, %v3074_v28  ;;  %v305_v50 = vrot.slane %v278_v49, 1  ;;  %2461 = vmatpush1.bf16.msk.msra.mxu1 %vm3020_vm2, %v2459_v42  ;;  %v279_v56 = vld [vmem:[%s3057_s20 + $0x18] sm:$0x3f]  ;;  %v527_v60 = vrot.slane %v3074_v28, 2 }
  0x1b   : > { %2475 = vmatpush1.bf16.msra.mxu0 %v2474_v29  ;;  %498 = vmatprep.mubr.f32.mxu0 %v2901_v7  ;;  %v307_v57 = vrot.slane %v279_v56, 1  ;;  %v528_v61 = vrot.slane %v3083_v32, 2  ;;  %v530_v63 = vrot.slane %v278_v49, 2  ;;  %v532_v1 = vrot.slane %v279_v56, 2  ;;  %v1932_v8 = vld [vmem:[%s3951_s3 + $0x140] sm:$0xff]  ;;  %v1934_v9 = vld [vmem:[%s3951_s3 + $0x150] sm:$0xff] }
  0x1c   : > { %2478 = vmatprep.subr.msk.bf16.mxu0 %vm3020_vm2, %v2476_v33  ;;  %v304_v51 = vsel %vm301_vm4, %v302_v36, %v303_v37  ;;  %2483 = vmatprep.subr.bf16.mxu1 %v2482_v46  ;;  %v306_v58 = vsel %vm301_vm4, %v303_v37, %v305_v50  ;;  %v2492_v10 = vpack.c.bf16 %v1934_v9, %v1932_v8  ;;  %v1937_v11 = vld [vmem:[%s3951_s3 + $0x168] sm:$0xff]  ;;  %v1939_v12 = vld [vmem:[%s3951_s3 + $0x178] sm:$0xff]  ;;  %v1936_v14 = vld [vmem:[%s3951_s3 + $0x160] sm:$0xff]  ;;  %s269_s20 = sand.u32 1, %s2891_s25   ;;  %s2841_s23 = sshll.u32 %s2905_s28, 4  ;;  %s2842_s23 = int_to_ptr.vmem [resolvable:$false] %s2841_s23 }
  0x1d   : > { %1900 = vmatmul.mubr.msk.f32.vlgmr.msra.gmra.mrb[0].mxu1 %vm309_vm3, %v304_v51  ;;  %v308_v62 = vsel %vm301_vm4, %v305_v50, %v307_v57  ;;  %v529_v0 = vsel %vm526_vm5, %v527_v60, %v528_v61  ;;  %v531_v2 = vsel %vm526_vm5, %v528_v61, %v530_v63  ;;  %v533_v3 = vsel %vm526_vm5, %v530_v63, %v532_v1  ;;  %v1938_v15 = vld [vmem:[%s3951_s3 + $0x170] sm:$0xff]  ;;  %v1941_v17 = vld [vmem:[%s3951_s3 + $0x188] sm:$0xff]  ;;  %v1943_v18 = vld [vmem:[%s3951_s3 + $0x198] sm:$0xff]  ;;  %s270_s16 = scalar_lea.vmem [#allocation3], %s269_s20  ;;  %s1817_s21 = scalar_lea.sflag [#allocation4], %s269_s20 }
  0x1e   : > { %1907 = vmatmul.mubr.msk.f32.gmra.mrb[2].mxu0 %vm309_vm3, %v3083_v32  ;;  %395 = vmatprep.mubr.f32.mxu1 %v2901_v7  ;;  %v2494_v13 = vpack.c.bf16 %v1939_v12, %v1937_v11  ;;  %v2496_v16 = vpack.c.bf16 %v1938_v15, %v1936_v14  ;;  %v2498_v19 = vpack.c.bf16 %v1943_v18, %v1941_v17  ;;  %v1940_v20 = vld [vmem:[%s3951_s3 + $0x180] sm:$0xff]  ;;  %v1942_v21 = vld [vmem:[%s3951_s3 + $0x190] sm:$0xff]  ;;  %v1945_v23 = vld [vmem:[%s3951_s3 + $0x1a8] sm:$0xff]  ;;  %s1829_s17 = sshll.u32 %s270_s16, 4  ;;  %s2843_s8 = scalar_lea.vmem %s2842_s23, 32  ;;  %s3907_s17 = int_to_ptr.vmem [resolvable:$true] %s1829_s17 }
  0x1f   : > { %504 = vmatprep.mubr.f32.mxu0 %v2901_v7  ;;  %2481 = vmatpush1.bf16.msk.msra.mxu0 %vm3020_vm2, %v2479_v45  ;;  %v2500_v22 = vpack.c.bf16 %v1942_v21, %v1940_v20  ;;  %v1947_v24 = vld [vmem:[%s3951_s3 + $0x1b8] sm:$0xff]  ;;  %v1944_v26 = vld [vmem:[%s3951_s3 + $0x1a0] sm:$0xff]  ;;  %v1946_v27 = vld [vmem:[%s3951_s3 + $0x1b0] sm:$0xff]  ;;  %s2837_s22 = scalar_lea.vmem %s3907_s17, 16  ;;  %p2844_p0 = scmp.lt.s32.totalorder %s3907_s17, %s2842_s23 }
  0x20   : > { %2485 = vmatpush1.bf16.msra.mxu1 %v2484_v52  ;;  %v2502_v25 = vpack.c.bf16 %v1947_v24, %v1945_v23  ;;  %v2504_v28 = vpack.c.bf16 %v1946_v27, %v1944_v26  ;;  %v1949_v29 = vld [vmem:[%s3951_s3 + $0x1c8] sm:$0xff]  ;;  %v1951_v30 = vld [vmem:[%s3951_s3 + $0x1d8] sm:$0xff]  ;;  %v1948_v32 = vld [vmem:[%s3951_s3 + $0x1c0] sm:$0xff]  ;;  %2626 = vmatprep.subr.bf16.mxu0 %v2903_v44  ;;  %p2838_p11 = scmp.ne.s32.totalorder %s3907_s17, %s2837_s22  ;;  %p2845_p1 = scmp.lt.s32.totalorder %s2843_s8, %s2837_s22 }
  0x21   : > { %2487 = vmatprep.subr.bf16.mxu1 %v2486_v53  ;;  %1901 = vmatmul.mubr.msk.f32.gmra.mrb[2].mxu1 %vm309_vm3, %v306_v58  ;;  %v2506_v31 = vpack.c.bf16 %v1951_v30, %v1949_v29  ;;  %v1950_v33 = vld [vmem:[%s3951_s3 + $0x1d0] sm:$0xff]  ;;  %v1953_v35 = vld [vmem:[%s3951_s3 + $0x1e8] sm:$0xff]  ;;  %v1955_v36 = vld [vmem:[%s3951_s3 + $0x1f8] sm:$0xff] }
  0x22   : > { %1908 = vmatmul.mubr.msk.f32.gmra.mrb[4].mxu0 %vm309_vm3, %v278_v49  ;;  %401 = vmatprep.mubr.f32.mxu1 %v2901_v7  ;;  %v2508_v34 = vpack.c.bf16 %v1950_v33, %v1948_v32  ;;  %v2510_v37 = vpack.c.bf16 %v1955_v36, %v1953_v35  ;;  %v1952_v38 = vld [vmem:[%s3951_s3 + $0x1e0] sm:$0xff]  ;;  %v1954_v39 = vld [vmem:[%s3951_s3 + $0x1f0] sm:$0xff]  ;;  %v728_v41 = vld [vmem:[%s3951_s3 + $0x8] sm:$0xff]  ;;  %p2839_p12 = pnand %p2838_p11, %p2984_p5  ;;  %p2846_p2 = por %p2845_p1, %p2844_p0 }
  0x23   : > { %510 = vmatprep.mubr.f32.mxu0 %v2901_v7  ;;  %v2512_v40 = vpack.c.bf16 %v1954_v39, %v1952_v38  ;;  %v730_v42 = vld [vmem:[%s3951_s3 + $0x18] sm:$0xff]  ;;  %v2004_v45 = vld [vmem:[%s3953_s5 + $0x100] sm:$0xff]  ;;  %v2005_v46 = vld [vmem:[%s3953_s5 + $0x108] sm:$0xff] }
  0x24   : > { %2489 = vmatpush1.bf16.msra.mxu1 %v2488_v59  ;;  %v2514_v43 = vpack.c.bf16 %v730_v42, %v728_v41  ;;  %v2627_v47 = vpack.c.bf16 %v2005_v46, %v2004_v45  ;;  %v2006_v48 = vld [vmem:[%s3953_s5 + $0x110] sm:$0xff]  ;;  %v2007_v49 = vld [vmem:[%s3953_s5 + $0x118] sm:$0xff]  ;;  %v2008_v51 = vld [vmem:[%s3953_s5 + $0x120] sm:$0xff]  ;;  %p2840_p13 = pneg %p2839_p12 }
  0x25   : > { %1902 = vmatmul.mubr.msk.f32.gmra.mrb[4].mxu1 %vm309_vm3, %v308_v62  ;;  %2491 = vmatprep.subr.bf16.mxu1 %v2490_v6  ;;  %v2630_v50 = vpack.c.bf16 %v2007_v49, %v2006_v48  ;;  %v2009_v52 = vld [vmem:[%s3953_s5 + $0x128] sm:$0xff]  ;;  %v645_v61 = vld [vmem:[%s3950_s2] sm:$0x3]  ;;  %v729_v38 = vld [vmem:[%s3951_s3 + $0x10] sm:$0xff] }
  0x26   : > { %1909 = vmatmul.mubr.msk.f32.gmra.mrb[6].mxu0 %vm309_vm3, %v279_v56  ;;  %407 = vmatprep.mubr.f32.mxu1 %v2901_v7  ;;  %v2633_v53 = vpack.c.bf16 %v2009_v52, %v2008_v51  ;;  %v3263_v56 = vshrl.u32 %v647_v54, 7  ;;  %v734_v45 = vld [vmem:[%s3951_s3 + $0x38] sm:$0xff]  ;;  %p2847_p3 = pnand %p2846_p2, %p2840_p13 }
  0x27   : > { %612 = vmatprep.mubr.f32.mxu0 %v2901_v7 }
  0x28   : > { %2493 = vmatpush1.bf16.msra.mxu1 %v2492_v10  ;;  %v649_v59 = vsub.s32 0, %v3263_v56  ;;  %v653_v62 = vsub.s32 1, %v3263_v56 }
  0x29   : > { %1903 = vmatmul.mubr.msk.f32.gmra.mrb[6].mxu1 %vm309_vm3, %v307_v57  ;;  %2495 = vmatprep.subr.bf16.mxu1 %v2494_v13 }
  0x2a   : > { %1920 = vmatmul.mubr.msk.f32.vlgmr.msra.gmra.mrb[0].mxu0 %vm309_vm3, %v529_v0  ;;  %860 = vmatprep.mubr.f32.mxu1 %v2901_v7  ;;  %v650_v0 = vrot.slane %v645_v61, %v649_v59 }
  0x2b   : > { %618 = vmatprep.mubr.f32.mxu0 %v2901_v7  ;;  %2628 = vmatpush3.bf16.msra.mxu0 %v2627_v47 }
  0x2c   : > { %2497 = vmatpush1.bf16.msra.mxu1 %v2496_v16  ;;  %2629 = vmatprep.subr.bf16.mxu0 %v2903_v44 }
  0x2d   : > { %2499 = vmatprep.subr.bf16.mxu1 %v2498_v19 }
  0x2e   : > { %1921 = vmatmul.mubr.msk.f32.gmra.mrb[2].mxu0 %vm309_vm3, %v531_v2 }
  0x2f   : > { %624 = vmatprep.mubr.f32.mxu0 %v2901_v7  ;;  %2631 = vmatpush3.bf16.msra.mxu0 %v2630_v50 }
  0x30   : > { %2501 = vmatpush1.bf16.msra.mxu1 %v2500_v22  ;;  %2632 = vmatprep.subr.bf16.mxu0 %v2903_v44 }
  0x31   : > { %2503 = vmatprep.subr.bf16.mxu1 %v2502_v25 }
  0x32   : > { %1922 = vmatmul.mubr.msk.f32.gmra.mrb[4].mxu0 %vm309_vm3, %v533_v3  ;;  %v654_v3 = vrot.slane %v645_v61, %v653_v62 }
  0x33   : > { %630 = vmatprep.mubr.f32.mxu0 %v2901_v7  ;;  %2634 = vmatpush3.bf16.msra.mxu0 %v2633_v53 }
  0x34   : > { %2505 = vmatpush1.bf16.msra.mxu1 %v2504_v28  ;;  %2635 = vmatprep.subr.bf16.mxu0 %v2903_v44 }
  0x35   : > { %2507 = vmatprep.subr.bf16.mxu1 %v2506_v31 }
  0x36   : > { %1923 = vmatmul.mubr.msk.f32.gmra.mrb[6].mxu0 %vm309_vm3, %v532_v1 }
  0x37   : > { %2309 = vmatprep.mubr.msk.f32.mxu0 %vm2904_vm6, %v2901_v7 }
  0x38   : > { %2509 = vmatpush1.bf16.msra.mxu1 %v2508_v34 }
  0x39   : > { %2511 = vmatprep.subr.bf16.mxu1 %v2510_v37  ;;  %v727_v37 = vld [vmem:[%s3951_s3] sm:$0xff] }
  0x3a   : > { %v2516_v51 = vpack.c.bf16 %v729_v38, %v727_v37  ;;  %v749_v37 = vld [vmem:[%s3951_s3 + $0xb0] sm:$0xff]  ;;  %v752_v38 = vld [vmem:[%s3951_s3 + $0xc8] sm:$0xff] }
  0x3c   : > { %2513 = vmatpush1.bf16.msra.mxu1 %v2512_v40 }
  0x3d   : > { %2515 = vmatprep.subr.bf16.mxu1 %v2514_v43  ;;  %v732_v43 = vld [vmem:[%s3951_s3 + $0x28] sm:$0xff] }
  0xf0   : > { %v391_v55 = vpop.f32.mrb[0].mxu1 }
  0xf1   : > { %v393_v57 = vpop.f32.mrb[1].mxu1 }
  0xf4   : > { %v397_v58 = vpop.f32.mrb[2].mxu1 }
  0xf5   : > { %v399_v60 = vpop.f32.mrb[3].mxu1 }
  0xf8   : > { %v403_v63 = vpop.f32.mrb[4].mxu1 }
  0xf9   : > { %v405_v1 = vpop.f32.mrb[5].mxu1 }
  0xfc   : > { %v409_v8 = vpop.f32.mrb[6].mxu1 }
  0xfd   : > { %v614_v2 = vpop.f32.mrb[0].mxu0  ;;  %v411_v10 = vpop.f32.mrb[7].mxu1 }
  0xfe   : > { %v2746_v4 = vadd.f32 %v614_v2, %v391_v55  ;;  %v616_v5 = vpop.f32.mrb[1].mxu0  ;;  %v2518_v55 = vpack.c.bf16 %v734_v45, %v732_v43  ;;  %v753_v43 = vld [vmem:[%s3951_s3 + $0xd0] sm:$0xff]  ;;  %v756_v45 = vld [vmem:[%s3951_s3 + $0xe8] sm:$0xff] }
  0xff   : > { %v2747_v6 = vadd.f32 %v616_v5, %v393_v57  ;;  %v731_v57 = vld [vmem:[%s3951_s3 + $0x20] sm:$0xff] }
 0x100   : > { %v657_v9 = vadd.f32 %v2746_v4, %v650_v0 }
 0x101   : > { %v658_v11 = vadd.f32 %v2747_v6, %v654_v3  ;;  %v620_v12 = vpop.f32.mrb[2].mxu0 }
 0x102   : > { %v2748_v13 = vadd.f32 %v620_v12, %v397_v58  ;;  %v622_v14 = vpop.f32.mrb[3].mxu0  ;;  %v665_v16 = vmax.f32 %v657_v9, 0.0  ;;  %v733_v58 = vld [vmem:[%s3951_s3 + $0x30] sm:$0xff] }
 0x103   : > { %v2749_v15 = vadd.f32 %v622_v14, %v399_v60  ;;  %v666_v18 = vmax.f32 %v658_v11, 0.0  ;;  %v2520_v5 = vpack.c.bf16 %v733_v58, %v731_v57  ;;  %v735_v11 = vld [vmem:[%s3951_s3 + $0x40] sm:$0xff]  ;;  %v737_v12 = vld [vmem:[%s3951_s3 + $0x50] sm:$0xff]  ;;  %v1961_v58 = vld [vmem:[%s3951_s3 + $0x228] sm:$0xff] }
 0x104   : > { %v659_v17 = vadd.f32 %v2748_v13, %v650_v0  ;;  %v681_v26 = vrot.slane %v665_v16, 1  ;;  %v1958_v57 = vld [vmem:[%s3951_s3 + $0x210] sm:$0xff] }
 0x105   : > { %v660_v19 = vadd.f32 %v2749_v15, %v654_v3  ;;  %v626_v20 = vpop.f32.mrb[4].mxu0  ;;  %v684_v29 = vrot.slane %v666_v18, 1 }
 0x106   : > { %v667_v21 = vmax.f32 %v659_v17, 0.0  ;;  %v2750_v22 = vadd.f32 %v626_v20, %v403_v63  ;;  %v628_v23 = vpop.f32.mrb[5].mxu0  ;;  %v742_v17 = vld [vmem:[%s3951_s3 + $0x78] sm:$0xff]  ;;  %v2524_v20 = vpack.c.bf16 %v737_v12, %v735_v11  ;;  %v1969_v11 = vld [vmem:[%s3951_s3 + $0x268] sm:$0xff] }
 0x107   : > { %v668_v24 = vmax.f32 %v660_v19, 0.0  ;;  %v2751_v25 = vadd.f32 %v628_v23, %v405_v1  ;;  %v738_v1 = vld [vmem:[%s3951_s3 + $0x58] sm:$0xff]  ;;  %v739_v23 = vld [vmem:[%s3951_s3 + $0x60] sm:$0xff] }
 0x108   : > { %v682_v27 = vrot.slane %v667_v21, 1  ;;  %v661_v28 = vadd.f32 %v2750_v22, %v650_v0  ;;  %v1971_v12 = vld [vmem:[%s3951_s3 + $0x278] sm:$0xff] }
 0x109   : > { %v685_v30 = vrot.slane %v668_v24, 1  ;;  %v662_v31 = vadd.f32 %v2751_v25, %v654_v3  ;;  %v632_v32 = vpop.f32.mrb[6].mxu0  ;;  %v744_v25 = vld [vmem:[%s3951_s3 + $0x88] sm:$0xff] }
 0x10a   : > { %v683_v33 = vsel %vm301_vm4, %v681_v26, %v682_v27  ;;  %v669_v34 = vmax.f32 %v661_v28, 0.0  ;;  %v2752_v35 = vadd.f32 %v632_v32, %v409_v8  ;;  %v634_v36 = vpop.f32.mrb[7].mxu0  ;;  %v746_v26 = vld [vmem:[%s3951_s3 + $0x98] sm:$0xff] }
 0x10b   : > { %v703_v39 = vmax.f32 %v665_v16, %v683_v33  ;;  %v686_v40 = vsel %vm301_vm4, %v684_v29, %v685_v30  ;;  %v670_v41 = vmax.f32 %v662_v31, 0.0  ;;  %v2753_v42 = vadd.f32 %v634_v36, %v411_v10  ;;  %v740_v16 = vld [vmem:[%s3951_s3 + $0x68] sm:$0xff]  ;;  %v743_v29 = vld [vmem:[%s3951_s3 + $0x80] sm:$0xff]  ;;  %v750_v32 = vld [vmem:[%s3951_s3 + $0xb8] sm:$0xff] }
 0x10c   : > { %v704_v46 = vmax.f32 %v666_v18, %v686_v40  ;;  %v687_v47 = vrot.slane %v669_v34, 1  ;;  %v663_v48 = vadd.f32 %v2752_v35, %v650_v0  ;;  %v736_v0 = vld [vmem:[%s3951_s3 + $0x48] sm:$0xff]  ;;  %v2526_v22 = vpack.c.bf16 %v742_v17, %v740_v16  ;;  %v747_v36 = vld [vmem:[%s3951_s3 + $0xa0] sm:$0xff]  ;;  %v1970_v16 = vld [vmem:[%s3951_s3 + $0x270] sm:$0xff] }
 0x10d   : > { %v689_v49 = vrot.slane %v670_v41, 1  ;;  %v664_v50 = vadd.f32 %v2753_v42, %v654_v3  ;;  %v2522_v10 = vpack.c.bf16 %v738_v1, %v736_v0  ;;  %v2530_v28 = vpack.c.bf16 %v746_v26, %v744_v25  ;;  %v748_v31 = vld [vmem:[%s3951_s3 + $0xa8] sm:$0xff]  ;;  %v751_v42 = vld [vmem:[%s3951_s3 + $0xc0] sm:$0xff]  ;;  %v1962_v1 = vld [vmem:[%s3951_s3 + $0x230] sm:$0xff] }
 0x10e   : > { %v711_v52 = vmax.f32 %v703_v39, %v704_v46  ;;  %v688_v53 = vsel %vm301_vm4, %v682_v27, %v687_v47  ;;  %v671_v54 = vmax.f32 %v663_v48, 0.0  ;;  %v2534_v35 = vpack.c.bf16 %v750_v32, %v748_v31  ;;  %v754_v39 = vld [vmem:[%s3951_s3 + $0xd8] sm:$0xff]  ;;  %v1960_v0 = vld [vmem:[%s3951_s3 + $0x220] sm:$0xff]  ;;  %v1977_v25 = vld [vmem:[%s3951_s3 + $0x2a8] sm:$0xff] }
 0x10f   : > { %v705_v60 = vmax.f32 %v667_v21, %v688_v53  ;;  %v690_v61 = vsel %vm301_vm4, %v685_v30, %v689_v49  ;;  %v672_v63 = vmax.f32 %v664_v50, 0.0  ;;  %v745_v30 = vld [vmem:[%s3951_s3 + $0x90] sm:$0xff]  ;;  %v2536_v40 = vpack.c.bf16 %v749_v37, %v747_v36  ;;  %v758_v46 = vld [vmem:[%s3951_s3 + $0xf8] sm:$0xff]  ;;  %v1981_v31 = vld [vmem:[%s3951_s3 + $0x2c8] sm:$0xff] }
 0x110   : > { %719 = vst [vmem:[#allocation2 + $0x2] sm:$0xff] %v711_v52  ;;  %v706_v2 = vmax.f32 %v668_v24, %v690_v61  ;;  %v691_v3 = vrot.slane %v671_v54, 1  ;;  %861 = vmatmul.mubr.f32.vlgmr.msra.gmra.mrb[8].mxu1 %v711_v52  ;;  %v741_v24 = vld [vmem:[%s3951_s3 + $0x70] sm:$0xff]  ;;  %v2532_v33 = vpack.c.bf16 %v745_v30, %v743_v29  ;;  %v2542_v48 = vpack.c.bf16 %v758_v46, %v756_v45  ;;  %v1959_v52 = vld [vmem:[%s3951_s3 + $0x218] sm:$0xff]  ;;  %v1976_v29 = vld [vmem:[%s3951_s3 + $0x2a0] sm:$0xff] }
 0x111   : > { %v693_v4 = vrot.slane %v672_v63, 1  ;;  %2517 = vmatpush1.bf16.msra.mxu1 %v2516_v51  ;;  %866 = vmatprep.mubr.f32.mxu1 %v2901_v7  ;;  %v2528_v27 = vpack.c.bf16 %v741_v24, %v739_v23  ;;  %v757_v50 = vld [vmem:[%s3951_s3 + $0xf0] sm:$0xff]  ;;  %v1957_v51 = vld [vmem:[%s3951_s3 + $0x208] sm:$0xff]  ;;  %v1979_v26 = vld [vmem:[%s3951_s3 + $0x2b8] sm:$0xff] }
 0x112   : > { %v712_v6 = vmax.f32 %v705_v60, %v706_v2  ;;  %v692_v8 = vsel %vm301_vm4, %v687_v47, %v691_v3  ;;  %v709_v9 = vmax.f32 %v671_v54, %v691_v3  ;;  %2519 = vmatprep.subr.bf16.mxu1 %v2518_v55  ;;  %v2540_v47 = vpack.c.bf16 %v753_v43, %v751_v42  ;;  %v1956_v55 = vld [vmem:[%s3951_s3 + $0x200] sm:$0xff]  ;;  %v1963_v60 = vld [vmem:[%s3951_s3 + $0x238] sm:$0xff]  ;;  %v1965_v3 = vld [vmem:[%s3951_s3 + $0x248] sm:$0xff] }
 0x113   : > { %v707_v13 = vmax.f32 %v669_v34, %v692_v8  ;;  %v694_v14 = vsel %vm301_vm4, %v689_v49, %v693_v4  ;;  %v710_v15 = vmax.f32 %v672_v63, %v693_v4  ;;  %v755_v49 = vld [vmem:[%s3951_s3 + $0xe0] sm:$0xff]  ;;  %v2546_v54 = vpack.c.bf16 %v1959_v52, %v1957_v51  ;;  %v1967_v4 = vld [vmem:[%s3951_s3 + $0x258] sm:$0xff]  ;;  %v1974_v23 = vld [vmem:[%s3951_s3 + $0x290] sm:$0xff] }
 0x114   : > { %720 = vst [vmem:[#allocation2 + $0xa] sm:$0xff] %v712_v6  ;;  %v708_v18 = vmax.f32 %v670_v41, %v694_v14  ;;  %867 = vmatmul.mubr.f32.gmra.mrb[10].mxu1 %v712_v6  ;;  %v2538_v41 = vpack.c.bf16 %v754_v39, %v752_v38  ;;  %v2544_v53 = vpack.c.bf16 %v757_v50, %v755_v49  ;;  %v1964_v8 = vld [vmem:[%s3951_s3 + $0x240] sm:$0xff]  ;;  %v1978_v30 = vld [vmem:[%s3951_s3 + $0x2b0] sm:$0xff]  ;;  %v1983_v32 = vld [vmem:[%s3951_s3 + $0x2d8] sm:$0xff] }
 0x115   : > { %v714_v19 = vmax.f32 %v709_v9, %v710_v15  ;;  %2521 = vmatpush1.bf16.msra.mxu1 %v2520_v5  ;;  %872 = vmatprep.mubr.f32.mxu1 %v2901_v7  ;;  %v2548_v61 = vpack.c.bf16 %v1958_v57, %v1956_v55  ;;  %v2550_v63 = vpack.c.bf16 %v1963_v60, %v1961_v58  ;;  %v1966_v9 = vld [vmem:[%s3951_s3 + $0x250] sm:$0xff]  ;;  %v1968_v15 = vld [vmem:[%s3951_s3 + $0x260] sm:$0xff]  ;;  %v1985_v37 = vld [vmem:[%s3951_s3 + $0x2e8] sm:$0xff] }
 0x116   : > { %v713_v21 = vmax.f32 %v707_v13, %v708_v18  ;;  %2523 = vmatprep.subr.bf16.mxu1 %v2522_v10  ;;  %v2552_v5 = vpack.c.bf16 %v1962_v1, %v1960_v0  ;;  %v2554_v6 = vpack.c.bf16 %v1967_v4, %v1965_v3  ;;  %v2556_v13 = vpack.c.bf16 %v1966_v9, %v1964_v8  ;;  %v1973_v18 = vld [vmem:[%s3951_s3 + $0x288] sm:$0xff]  ;;  %v1982_v36 = vld [vmem:[%s3951_s3 + $0x2d0] sm:$0xff]  ;;  %v1987_v38 = vld [vmem:[%s3951_s3 + $0x2f8] sm:$0xff] }
 0x117   : > { %722 = vst [vmem:[#allocation2 + $0x1a] sm:$0x7] %v714_v19  ;;  %v723_v2 = vld [vmem:[#allocation2] sm:$0xff]  ;;  %v2558_v14 = vpack.c.bf16 %v1971_v12, %v1969_v11  ;;  %v1975_v19 = vld [vmem:[%s3951_s3 + $0x298] sm:$0xff]  ;;  %v1179_v45 = vld [vmem:[%s3953_s5] sm:$0xff] }
 0x118   : > { %721 = vst [vmem:[#allocation2 + $0x12] sm:$0xff] %v713_v21  ;;  %873 = vmatmul.mubr.f32.gmra.mrb[12].mxu1 %v713_v21  ;;  %v2562_v21 = vpack.c.bf16 %v1975_v19, %v1973_v18  ;;  %v1986_v42 = vld [vmem:[%s3951_s3 + $0x2f0] sm:$0xff]  ;;  %v1180_v46 = vld [vmem:[%s3953_s5 + $0x8] sm:$0xff]  ;;  %v1182_v49 = vld [vmem:[%s3953_s5 + $0x18] sm:$0xff] }
 0x119   : > { %2525 = vmatpush1.bf16.msra.mxu1 %v2524_v20  ;;  %878 = vmatprep.mubr.f32.mxu1 %v2901_v7  ;;  %v2560_v20 = vpack.c.bf16 %v1970_v16, %v1968_v15  ;;  %v1183_v52 = vld [vmem:[%s3953_s5 + $0x20] sm:$0xff]  ;;  %v1185_v57 = vld [vmem:[%s3953_s5 + $0x30] sm:$0xff]  ;;  %v1186_v58 = vld [vmem:[%s3953_s5 + $0x38] sm:$0xff] }
 0x11a   : > { %2527 = vmatprep.subr.bf16.mxu1 %v2526_v22  ;;  %v1972_v22 = vld [vmem:[%s3951_s3 + $0x280] sm:$0xff]  ;;  %v1188_v1 = vld [vmem:[%s3953_s5 + $0x48] sm:$0xff]  ;;  %v2010_v3 = vld [vmem:[%s3953_s5 + $0x130] sm:$0xff] }
 0x11b   : > { %v724_v10 = vld [vmem:[#allocation2 + $0x8] sm:$0xff]  ;;  %v1187_v0 = vld [vmem:[%s3953_s5 + $0x40] sm:$0xff]  ;;  %v2013_v11 = vld [vmem:[%s3953_s5 + $0x148] sm:$0xff] }
 0x11c   : > { %v974_v50 = vld [vmem:[#allocation2 + $0x4] sm:$0xff]  ;;  %v2012_v9 = vld [vmem:[%s3953_s5 + $0x140] sm:$0xff] }
 0x11d   : > { %2529 = vmatpush1.bf16.msra.mxu1 %v2528_v27  ;;  %v2564_v27 = vpack.c.bf16 %v1974_v23, %v1972_v22  ;;  %v2011_v4 = vld [vmem:[%s3953_s5 + $0x138] sm:$0xff]  ;;  %v2639_v12 = vpack.c.bf16 %v2013_v11, %v2012_v9  ;;  %v2014_v15 = vld [vmem:[%s3953_s5 + $0x150] sm:$0xff]  ;;  %v2017_v23 = vld [vmem:[%s3953_s5 + $0x168] sm:$0xff] }
 0x11e   : > { %v762_v34 = vld [vmem:[#allocation2 + $0x1a] sm:$0x7]  ;;  %2531 = vmatprep.subr.bf16.mxu1 %v2530_v28  ;;  %v2566_v28 = vpack.c.bf16 %v1979_v26, %v1977_v25  ;;  %v1190_v8 = vld [vmem:[%s3953_s5 + $0x58] sm:$0xff]  ;;  %v1193_v19 = vld [vmem:[%s3953_s5 + $0x70] sm:$0xff] }
 0x11f   : > { %879 = vmatmul.mubr.f32.gmra.mrb[14].mxu1 %v762_v34  ;;  %v725_v17 = vld [vmem:[#allocation2 + $0x10] sm:$0xff]  ;;  %v726_v24 = vld [vmem:[#allocation2 + $0x18] sm:$0x7]  ;;  %v2570_v34 = vpack.c.bf16 %v1983_v32, %v1981_v31  ;;  %v2018_v25 = vld [vmem:[%s3953_s5 + $0x170] sm:$0xff] }
 0x120   : > { %949 = vmatprep.mubr.f32.mxu1 %v2901_v7  ;;  %v976_v60 = vld [vmem:[#allocation2 + $0x14] sm:$0xff]  ;;  %v2019_v26 = vld [vmem:[%s3953_s5 + $0x178] sm:$0xff] }
 0x121   : > { %2533 = vmatpush1.bf16.msra.mxu1 %v2532_v33  ;;  %v2568_v33 = vpack.c.bf16 %v1978_v30, %v1976_v29  ;;  %v2020_v9 = vld [vmem:[%s3953_s5 + $0x180] sm:$0xff] }
 0x122   : > { %2535 = vmatprep.subr.bf16.mxu1 %v2534_v35  ;;  %v1980_v35 = vld [vmem:[%s3951_s3 + $0x2c0] sm:$0xff] }
 0x123   : > { %v2572_v39 = vpack.c.bf16 %v1982_v36, %v1980_v35 }
 0x125   : > { %2537 = vmatpush1.bf16.msra.mxu1 %v2536_v40  ;;  %v2574_v40 = vpack.c.bf16 %v1987_v38, %v1985_v37 }
 0x126   : > { %2539 = vmatprep.subr.bf16.mxu1 %v2538_v41  ;;  %v1984_v41 = vld [vmem:[%s3951_s3 + $0x2e0] sm:$0xff] }
 0x127   : > { %v2576_v43 = vpack.c.bf16 %v1986_v42, %v1984_v41 }
 0x129   : > { %2541 = vmatpush1.bf16.msra.mxu1 %v2540_v47  ;;  %v2579_v47 = vpack.c.bf16 %v1180_v46, %v1179_v45 }
 0x12a   : > { %2543 = vmatprep.subr.bf16.mxu1 %v2542_v48  ;;  %v1181_v48 = vld [vmem:[%s3953_s5 + $0x10] sm:$0xff] }
 0x12b   : > { %v2582_v51 = vpack.c.bf16 %v1182_v49, %v1181_v48 }
 0x12d   : > { %2545 = vmatpush1.bf16.msra.mxu1 %v2544_v53  ;;  %v1184_v53 = vld [vmem:[%s3953_s5 + $0x28] sm:$0xff] }
 0x12e   : > { %2547 = vmatprep.subr.bf16.mxu1 %v2546_v54  ;;  %v975_v54 = vld [vmem:[#allocation2 + $0xc] sm:$0xff]  ;;  %v2585_v55 = vpack.c.bf16 %v1184_v53, %v1183_v52  ;;  %v1989_v52 = vld [vmem:[%s3953_s5 + $0x88] sm:$0xff] }
 0x130   : > { %950 = vmatmul.mubr.f32.vlgmr.msra.gmra.mrb[8].mxu1 %v723_v2  ;;  %v2591_v2 = vpack.c.bf16 %v1188_v1, %v1187_v0 }
 0x131   : > { %2549 = vmatpush1.bf16.msra.mxu1 %v2548_v61  ;;  %955 = vmatprep.mubr.f32.mxu1 %v2901_v7  ;;  %v2588_v61 = vpack.c.bf16 %v1186_v58, %v1185_v57 }
 0x132   : > { %2551 = vmatprep.subr.bf16.mxu1 %v2550_v63  ;;  %v977_v63 = vld [vmem:[#allocation2 + $0x1c] sm:$0x7] }
 0x134   : > { %956 = vmatmul.mubr.f32.gmra.mrb[10].mxu1 %v724_v10 }
 0x135   : > { %2553 = vmatpush1.bf16.msra.mxu1 %v2552_v5  ;;  %961 = vmatprep.mubr.f32.mxu1 %v2901_v7  ;;  %v2636_v5 = vpack.c.bf16 %v2011_v4, %v2010_v3  ;;  %v1990_v3 = vld [vmem:[%s3953_s5 + $0x90] sm:$0xff] }
 0x136   : > { %2555 = vmatprep.subr.bf16.mxu1 %v2554_v6  ;;  %v1189_v6 = vld [vmem:[%s3953_s5 + $0x50] sm:$0xff] }
 0x137   : > { %2637 = vmatpush3.bf16.msra.mxu0 %v2636_v5  ;;  %v2594_v10 = vpack.c.bf16 %v1190_v8, %v1189_v6  ;;  %v1991_v8 = vld [vmem:[%s3953_s5 + $0x98] sm:$0xff] }
 0x138   : > { %962 = vmatmul.mubr.f32.gmra.mrb[12].mxu1 %v725_v17  ;;  %2638 = vmatprep.subr.bf16.mxu0 %v2903_v44  ;;  %v2015_v17 = vld [vmem:[%s3953_s5 + $0x158] sm:$0xff] }
 0x139   : > { %2557 = vmatpush1.bf16.msra.mxu1 %v2556_v13  ;;  %967 = vmatprep.mubr.f32.mxu1 %v2901_v7  ;;  %v1191_v13 = vld [vmem:[%s3953_s5 + $0x60] sm:$0xff]  ;;  %v2642_v18 = vpack.c.bf16 %v2015_v17, %v2014_v15  ;;  %v2606_v17 = vpack.c.bf16 %v1991_v8, %v1990_v3  ;;  %v2037_v8 = vld [vmem:[%s3953_s5 + $0x208] sm:$0xff] }
 0x13a   : > { %2559 = vmatprep.subr.bf16.mxu1 %v2558_v14  ;;  %v1192_v14 = vld [vmem:[%s3953_s5 + $0x68] sm:$0xff] }
 0x13b   : > { %2640 = vmatpush3.bf16.msra.mxu0 %v2639_v12  ;;  %v2597_v16 = vpack.c.bf16 %v1192_v14, %v1191_v13 }
 0x13c   : > { %968 = vmatmul.mubr.f32.gmra.mrb[14].mxu1 %v726_v24  ;;  %2641 = vmatprep.subr.bf16.mxu0 %v2903_v44 }
 0x13d   : > { %2561 = vmatpush1.bf16.msra.mxu1 %v2560_v20  ;;  %1075 = vmatprep.mubr.f32.mxu1 %v2901_v7  ;;  %v1194_v20 = vld [vmem:[%s3953_s5 + $0x78] sm:$0xff] }
 0x13e   : > { %2563 = vmatprep.subr.bf16.mxu1 %v2562_v21  ;;  %v2016_v21 = vld [vmem:[%s3953_s5 + $0x160] sm:$0xff]  ;;  %v2600_v22 = vpack.c.bf16 %v1194_v20, %v1193_v19 }
 0x13f   : > { %2643 = vmatpush3.bf16.msra.mxu0 %v2642_v18  ;;  %v2645_v24 = vpack.c.bf16 %v2017_v23, %v2016_v21  ;;  %v1992_v19 = vld [vmem:[%s3953_s5 + $0xa0] sm:$0xff]  ;;  %v1993_v23 = vld [vmem:[%s3953_s5 + $0xa8] sm:$0xff] }
 0x140   : > { %2644 = vmatprep.subr.bf16.mxu0 %v2903_v44 }
 0x141   : > { %2565 = vmatpush1.bf16.msra.mxu1 %v2564_v27  ;;  %v2648_v27 = vpack.c.bf16 %v2019_v26, %v2018_v25  ;;  %v2023_v25 = vld [vmem:[%s3953_s5 + $0x198] sm:$0xff] }
 0x142   : > { %2567 = vmatprep.subr.bf16.mxu1 %v2566_v28  ;;  %v1108_v28 = vld [vmem:[%s3952_s4] sm:$0x3] }
 0x143   : > { %2646 = vmatpush3.bf16.msra.mxu0 %v2645_v24  ;;  %v1113_v29 = vrot.slane %v1108_v28, %v649_v59  ;;  %v1117_v30 = vrot.slane %v1108_v28, %v653_v62  ;;  %v2022_v24 = vld [vmem:[%s3953_s5 + $0x190] sm:$0xff] }
 0x144   : > { %2647 = vmatprep.subr.bf16.mxu0 %v2903_v44 }
 0x145   : > { %2569 = vmatpush1.bf16.msra.mxu1 %v2568_v33 }
 0x146   : > { %2571 = vmatprep.subr.bf16.mxu1 %v2570_v34 }
 0x147   : > { %2649 = vmatpush3.bf16.msra.mxu0 %v2648_v27 }
 0x148   : > { %2650 = vmatprep.subr.bf16.mxu0 %v2903_v44 }
 0x149   : > { %2573 = vmatpush1.bf16.msra.mxu1 %v2572_v39 }
 0x14a   : > { %2575 = vmatprep.subr.bf16.mxu1 %v2574_v40 }
 0x14d   : > { %2577 = vmatpush1.bf16.msra.mxu1 %v2576_v43 }
 0x14e   : > { %2578 = vmatprep.subr.bf16.mxu1 %v2903_v44 }
 0x150   : > { %1076 = vmatmul.mubr.f32.vlgmr.msra.gmra.mrb[8].mxu1 %v974_v50 }
 0x151   : > { %1081 = vmatprep.mubr.f32.mxu1 %v2901_v7  ;;  %2580 = vmatpush3.bf16.msra.mxu1 %v2579_v47 }
 0x152   : > { %2581 = vmatprep.subr.bf16.mxu1 %v2903_v44 }
 0x154   : > { %1082 = vmatmul.mubr.f32.gmra.mrb[10].mxu1 %v975_v54 }
 0x155   : > { %1087 = vmatprep.mubr.f32.mxu1 %v2901_v7  ;;  %2583 = vmatpush3.bf16.msra.mxu1 %v2582_v51  ;;  %v1988_v51 = vld [vmem:[%s3953_s5 + $0x80] sm:$0xff] }
 0x156   : > { %2584 = vmatprep.subr.bf16.mxu1 %v2903_v44 }
 0x158   : > { %1088 = vmatmul.mubr.f32.gmra.mrb[12].mxu1 %v976_v60 }
 0x159   : > { %1093 = vmatprep.mubr.f32.mxu1 %v2901_v7  ;;  %2586 = vmatpush3.bf16.msra.mxu1 %v2585_v55 }
 0x15a   : > { %2587 = vmatprep.subr.bf16.mxu1 %v2903_v44 }
 0x15c   : > { %1094 = vmatmul.mubr.f32.gmra.mrb[14].mxu1 %v977_v63 }
 0x15d   : > { %2589 = vmatpush3.bf16.msra.mxu1 %v2588_v61  ;;  %2239 = vmatprep.mubr.msk.f32.mxu1 %vm2904_vm6, %v2901_v7 }
 0x15e   : > { %2590 = vmatprep.subr.bf16.mxu1 %v2903_v44 }
 0x161   : > { %2592 = vmatpush3.bf16.msra.mxu1 %v2591_v2  ;;  %v2603_v2 = vpack.c.bf16 %v1989_v52, %v1988_v51  ;;  %v2001_v51 = vld [vmem:[%s3953_s5 + $0xe8] sm:$0xff]  ;;  %v2030_v52 = vld [vmem:[%s3953_s5 + $0x1d0] sm:$0xff] }
 0x162   : > { %2593 = vmatprep.subr.bf16.mxu1 %v2903_v44 }
 0x165   : > { %2595 = vmatpush3.bf16.msra.mxu1 %v2594_v10  ;;  %v2021_v10 = vld [vmem:[%s3953_s5 + $0x188] sm:$0xff] }
 0x166   : > { %2596 = vmatprep.subr.bf16.mxu1 %v2903_v44  ;;  %v2651_v18 = vpack.c.bf16 %v2021_v10, %v2020_v9 }
 0x169   : > { %2598 = vmatpush3.bf16.msra.mxu1 %v2597_v16 }
 0x16a   : > { %2599 = vmatprep.subr.bf16.mxu1 %v2903_v44 }
 0x16d   : > { %2601 = vmatpush3.bf16.msra.mxu1 %v2600_v22 }
 0x16e   : > { %2602 = vmatprep.subr.bf16.mxu1 %v2903_v44 }
 0x223   : > { %v1077_v31 = vpop.f32.mrb[8].mxu1 }
 0x224   : > { %v1120_v32 = vadd.f32 %v1113_v29, %v1077_v31  ;;  %v1079_v33 = vpop.f32.mrb[9].mxu1  ;;  %v2609_v31 = vpack.c.bf16 %v1993_v23, %v1992_v19  ;;  %v2044_v19 = vld [vmem:[%s3953_s5 + $0x240] sm:$0xff]  ;;  %v2046_v23 = vld [vmem:[%s3953_s5 + $0x250] sm:$0xff] }
 0x225   : > { %v1121_v34 = vadd.f32 %v1117_v30, %v1079_v33  ;;  %v1994_v33 = vld [vmem:[%s3953_s5 + $0xb0] sm:$0xff] }
 0x226   : > { %v1128_v36 = vmax.f32 %v1120_v32, 0.0  ;;  %v2654_v32 = vpack.c.bf16 %v2023_v25, %v2022_v24  ;;  %v2047_v24 = vld [vmem:[%s3953_s5 + $0x258] sm:$0xff] }
 0x227   : > { %v1083_v35 = vpop.f32.mrb[10].mxu1  ;;  %v1129_v39 = vmax.f32 %v1121_v34, 0.0  ;;  %v1995_v34 = vld [vmem:[%s3953_s5 + $0xb8] sm:$0xff]  ;;  %v2690_v25 = vpack.c.bf16 %v2047_v24, %v2046_v23  ;;  %v1178_v23 = vld [vmem:[%s3954_s6] sm:$0x1] }
 0x228   : > { %v1122_v37 = vadd.f32 %v1113_v29, %v1083_v35  ;;  %v1085_v38 = vpop.f32.mrb[11].mxu1  ;;  %v1144_v45 = vrot.slane %v1128_v36, 2  ;;  %v2024_v35 = vld [vmem:[%s3953_s5 + $0x1a0] sm:$0xff] }
 0x229   : > { %v1123_v40 = vadd.f32 %v1117_v30, %v1085_v38  ;;  %v1147_v48 = vrot.slane %v1129_v39, 2  ;;  %v2612_v38 = vpack.c.bf16 %v1995_v34, %v1994_v33  ;;  %v2052_v34 = vld [vmem:[%s3953_s5 + $0x280] sm:$0xff] }
 0x22a   : > { %v1130_v41 = vmax.f32 %v1122_v37, 0.0 }
 0x22b   : > { %v1131_v42 = vmax.f32 %v1123_v40, 0.0  ;;  %v1089_v43 = vpop.f32.mrb[12].mxu1  ;;  %v1996_v40 = vld [vmem:[%s3953_s5 + $0xc0] sm:$0xff] }
 0x22c   : > { %v1145_v46 = vrot.slane %v1130_v41, 2  ;;  %v1124_v47 = vadd.f32 %v1113_v29, %v1089_v43  ;;  %v1091_v59 = vpop.f32.mrb[13].mxu1  ;;  %v2027_v43 = vld [vmem:[%s3953_s5 + $0x1b8] sm:$0xff] }
 0x22d   : > { %v1148_v56 = vrot.slane %v1131_v42, 2  ;;  %v1125_v62 = vadd.f32 %v1117_v30, %v1091_v59  ;;  %v1999_v59 = vld [vmem:[%s3953_s5 + $0xd8] sm:$0xff] }
 0x22e   : > { %v1146_v49 = vsel %vm526_vm5, %v1144_v45, %v1145_v46  ;;  %v1132_v50 = vmax.f32 %v1124_v47, 0.0  ;;  %v1998_v47 = vld [vmem:[%s3953_s5 + $0xd0] sm:$0xff] }
 0x22f   : > { %v1166_v53 = vmax.f32 %v1128_v36, %v1146_v49  ;;  %v1149_v54 = vsel %vm526_vm5, %v1147_v48, %v1148_v56  ;;  %v1133_v55 = vmax.f32 %v1125_v62, 0.0  ;;  %v1095_v57 = vpop.f32.mrb[14].mxu1  ;;  %v2025_v36 = vld [vmem:[%s3953_s5 + $0x1a8] sm:$0xff]  ;;  %v2028_v48 = vld [vmem:[%s3953_s5 + $0x1c0] sm:$0xff]  ;;  %v2618_v62 = vpack.c.bf16 %v1999_v59, %v1998_v47 }
 0x230   : > { %v1167_v58 = vmax.f32 %v1129_v39, %v1149_v54  ;;  %v1150_v60 = vrot.slane %v1132_v50, 2  ;;  %v1126_v61 = vadd.f32 %v1113_v29, %v1095_v57  ;;  %v1097_v63 = vpop.f32.mrb[15].mxu1  ;;  %v2657_v39 = vpack.c.bf16 %v2025_v36, %v2024_v35  ;;  %v2002_v57 = vld [vmem:[%s3953_s5 + $0xf0] sm:$0xff]  ;;  %v2053_v35 = vld [vmem:[%s3953_s5 + $0x288] sm:$0xff]  ;;  %v2060_v59 = vld [vmem:[%s3953_s5 + $0x2c0] sm:$0xff] }
 0x231   : > { %v1152_v0 = vrot.slane %v1133_v55, 2  ;;  %v1127_v1 = vadd.f32 %v1117_v30, %v1097_v63  ;;  %v2699_v36 = vpack.c.bf16 %v2053_v35, %v2052_v34 }
 0x232   : > { %v3591_v4 = vmax.f32 %v1166_v53, %v1167_v58  ;;  %v1151_v5 = vsel %vm526_vm5, %v1145_v46, %v1150_v60  ;;  %v1134_v6 = vmax.f32 %v1126_v61, 0.0  ;;  %v2031_v53 = vld [vmem:[%s3953_s5 + $0x1d8] sm:$0xff]  ;;  %v2033_v61 = vld [vmem:[%s3953_s5 + $0x1e8] sm:$0xff] }
 0x233   : > { %v1168_v11 = vmax.f32 %v1130_v41, %v1151_v5  ;;  %v1153_v12 = vsel %vm526_vm5, %v1148_v56, %v1152_v0  ;;  %v1135_v13 = vmax.f32 %v1127_v1, 0.0  ;;  %v1997_v41 = vld [vmem:[%s3953_s5 + $0xc8] sm:$0xff]  ;;  %v2003_v58 = vld [vmem:[%s3953_s5 + $0xf8] sm:$0xff]  ;;  %v2034_v1 = vld [vmem:[%s3953_s5 + $0x1f0] sm:$0xff] }
 0x234   : > { %v1169_v14 = vmax.f32 %v1131_v42, %v1153_v12  ;;  %v1154_v15 = vrot.slane %v1134_v6, 2  ;;  %2240 = vmatmul.mubr.f32.vlgmr.msra.gmra.mrb[16].mxu1 %v3591_v4  ;;  %v2026_v42 = vld [vmem:[%s3953_s5 + $0x1b0] sm:$0xff]  ;;  %v2615_v45 = vpack.c.bf16 %v1997_v41, %v1996_v40  ;;  %v2029_v56 = vld [vmem:[%s3953_s5 + $0x1c8] sm:$0xff]  ;;  %v2624_v63 = vpack.c.bf16 %v2003_v58, %v2002_v57  ;;  %v2056_v41 = vld [vmem:[%s3953_s5 + $0x2a0] sm:$0xff] }
 0x235   : > { %v1156_v16 = vrot.slane %v1135_v13, 2  ;;  %2604 = vmatpush3.bf16.msra.mxu1 %v2603_v2  ;;  %2274 = vmatprep.mubr.msk.f32.mxu1 %vm2904_vm6, %v2901_v7  ;;  %v2660_v46 = vpack.c.bf16 %v2027_v43, %v2026_v42  ;;  %v2663_v49 = vpack.c.bf16 %v2029_v56, %v2028_v48  ;;  %v2035_v2 = vld [vmem:[%s3953_s5 + $0x1f8] sm:$0xff]  ;;  %v1284_v5 = vrot.slane %v3591_v4, 4  ;;  %v2038_v4 = vld [vmem:[%s3953_s5 + $0x210] sm:$0xff]  ;;  %v2057_v42 = vld [vmem:[%s3953_s5 + $0x2a8] sm:$0xff] }
 0x236   : > { %v3610_v20 = vmax.f32 %v1168_v11, %v1169_v14  ;;  %v1155_v21 = vsel %vm526_vm5, %v1150_v60, %v1154_v15  ;;  %v3613_v22 = vmax.f32 %v1134_v6, %v1154_v15  ;;  %2605 = vmatprep.subr.bf16.mxu1 %v2903_v44  ;;  %v2032_v60 = vld [vmem:[%s3953_s5 + $0x1e0] sm:$0xff]  ;;  %v2672_v3 = vpack.c.bf16 %v2035_v2, %v2034_v1  ;;  %v2039_v11 = vld [vmem:[%s3953_s5 + $0x218] sm:$0xff]  ;;  %v2041_v14 = vld [vmem:[%s3953_s5 + $0x228] sm:$0xff] }
 0x237   : > { %v1170_v26 = vmax.f32 %v1132_v50, %v1155_v21  ;;  %v1157_v27 = vsel %vm526_vm5, %v1152_v0, %v1156_v16  ;;  %v3626_v28 = vmax.f32 %v1135_v13, %v1156_v16  ;;  %v2000_v50 = vld [vmem:[%s3953_s5 + $0xe0] sm:$0xff]  ;;  %v2669_v0 = vpack.c.bf16 %v2033_v61, %v2032_v60  ;;  %v2042_v16 = vld [vmem:[%s3953_s5 + $0x230] sm:$0xff]  ;;  %v2061_v48 = vld [vmem:[%s3953_s5 + $0x2c8] sm:$0xff] }
 0x238   : > { %v1171_v29 = vmax.f32 %v1133_v55, %v1157_v27  ;;  %2310 = vmatmul.mubr.f32.vlgmr.msra.gmra.mrb[8].mxu0 %v3610_v20  ;;  %v2621_v54 = vpack.c.bf16 %v2001_v51, %v2000_v50  ;;  %v2666_v55 = vpack.c.bf16 %v2031_v53, %v2030_v52  ;;  %v2036_v6 = vld [vmem:[%s3953_s5 + $0x200] sm:$0xff]  ;;  %v1463_v10 = vrot.slane %v3610_v20, 4  ;;  %v2045_v20 = vld [vmem:[%s3953_s5 + $0x248] sm:$0xff]  ;;  %v2071_v1 = vld [vmem:[%s3953_s5 + $0x318] sm:$0xff] }
 0x239   : > { %v1177_v30 = vmax.f32 %v3613_v22, %v3626_v28  ;;  %2607 = vmatpush3.bf16.msra.mxu1 %v2606_v17  ;;  %2652 = vmatpush3.bf16.msra.mxu0 %v2651_v18  ;;  %v2675_v9 = vpack.c.bf16 %v2037_v8, %v2036_v6  ;;  %v2678_v12 = vpack.c.bf16 %v2039_v11, %v2038_v4  ;;  %v2040_v13 = vld [vmem:[%s3953_s5 + $0x220] sm:$0xff]  ;;  %v2043_v17 = vld [vmem:[%s3953_s5 + $0x238] sm:$0xff]  ;;  %v2049_v27 = vld [vmem:[%s3953_s5 + $0x268] sm:$0xff] }
 0x23a   : > { %2608 = vmatprep.subr.bf16.mxu1 %v2903_v44  ;;  %2653 = vmatprep.subr.bf16.mxu0 %v2903_v44  ;;  %v3645_v37 = vmax.f32 %v1170_v26, %v1171_v29  ;;  %v2681_v15 = vpack.c.bf16 %v2041_v14, %v2040_v13  ;;  %v2684_v18 = vpack.c.bf16 %v2043_v17, %v2042_v16  ;;  %v2048_v26 = vld [vmem:[%s3953_s5 + $0x260] sm:$0xff]  ;;  %v2065_v52 = vld [vmem:[%s3953_s5 + $0x2e8] sm:$0xff]  ;;  %v2074_v6 = vld [vmem:[%s3953_s5 + $0x330] sm:$0xff] }
 0x23b   : > { %2344 = vmatprep.mubr.msk.f32.mxu0 %vm2904_vm6, %v2901_v7  ;;  %v2687_v21 = vpack.c.bf16 %v2045_v20, %v2044_v19  ;;  %v2693_v29 = vpack.c.bf16 %v2049_v27, %v2048_v26  ;;  %v2705_v43 = vpack.c.bf16 %v2057_v42, %v2056_v41  ;;  %v2711_v56 = vpack.c.bf16 %v2061_v48, %v2060_v59  ;;  %v2064_v51 = vld [vmem:[%s3953_s5 + $0x2e0] sm:$0xff]  ;;  %v2069_v60 = vld [vmem:[%s3953_s5 + $0x308] sm:$0xff]  ;;  %v2078_v11 = vld [vmem:[%s3953_s5 + $0x350] sm:$0xff] }
 0x23c   : > { %v2717_v53 = vpack.c.bf16 %v2065_v52, %v2064_v51  ;;  %v2068_v58 = vld [vmem:[%s3953_s5 + $0x300] sm:$0xff]  ;;  %v2082_v17 = vld [vmem:[%s3953_s5 + $0x370] sm:$0xff] }
 0x23d   : > { %2610 = vmatpush3.bf16.msra.mxu1 %v2609_v31  ;;  %2655 = vmatpush3.bf16.msra.mxu0 %v2654_v32  ;;  %v2050_v31 = vld [vmem:[%s3953_s5 + $0x270] sm:$0xff]  ;;  %v2051_v32 = vld [vmem:[%s3953_s5 + $0x278] sm:$0xff]  ;;  %v2723_v61 = vpack.c.bf16 %v2069_v60, %v2068_v58  ;;  %v2080_v14 = vld [vmem:[%s3953_s5 + $0x360] sm:$0xff] }
 0x23e   : > { %2611 = vmatprep.subr.bf16.mxu1 %v2903_v44  ;;  %2656 = vmatprep.subr.bf16.mxu0 %v2903_v44  ;;  %v2696_v33 = vpack.c.bf16 %v2051_v32, %v2050_v31 }
 0x241   : > { %2613 = vmatpush3.bf16.msra.mxu1 %v2612_v38  ;;  %2658 = vmatpush3.bf16.msra.mxu0 %v2657_v39  ;;  %v2054_v38 = vld [vmem:[%s3953_s5 + $0x290] sm:$0xff]  ;;  %v2055_v39 = vld [vmem:[%s3953_s5 + $0x298] sm:$0xff] }
 0x242   : > { %2614 = vmatprep.subr.bf16.mxu1 %v2903_v44  ;;  %2659 = vmatprep.subr.bf16.mxu0 %v2903_v44  ;;  %v2702_v40 = vpack.c.bf16 %v2055_v39, %v2054_v38 }
 0x245   : > { %2616 = vmatpush3.bf16.msra.mxu1 %v2615_v45  ;;  %2661 = vmatpush3.bf16.msra.mxu0 %v2660_v46  ;;  %v2058_v45 = vld [vmem:[%s3953_s5 + $0x2b0] sm:$0xff]  ;;  %v2059_v46 = vld [vmem:[%s3953_s5 + $0x2b8] sm:$0xff] }
 0x246   : > { %2617 = vmatprep.subr.bf16.mxu1 %v2903_v44  ;;  %2662 = vmatprep.subr.bf16.mxu0 %v2903_v44  ;;  %v2708_v47 = vpack.c.bf16 %v2059_v46, %v2058_v45 }
 0x249   : > { %2619 = vmatpush3.bf16.msra.mxu1 %v2618_v62  ;;  %2664 = vmatpush3.bf16.msra.mxu0 %v2663_v49  ;;  %v2062_v62 = vld [vmem:[%s3953_s5 + $0x2d0] sm:$0xff]  ;;  %v2063_v49 = vld [vmem:[%s3953_s5 + $0x2d8] sm:$0xff] }
 0x24a   : > { %2620 = vmatprep.subr.bf16.mxu1 %v2903_v44  ;;  %2665 = vmatprep.subr.bf16.mxu0 %v2903_v44  ;;  %v2714_v50 = vpack.c.bf16 %v2063_v49, %v2062_v62 }
 0x24d   : > { %2622 = vmatpush3.bf16.msra.mxu1 %v2621_v54  ;;  %2667 = vmatpush3.bf16.msra.mxu0 %v2666_v55  ;;  %v2066_v54 = vld [vmem:[%s3953_s5 + $0x2f0] sm:$0xff]  ;;  %v2067_v55 = vld [vmem:[%s3953_s5 + $0x2f8] sm:$0xff] }
 0x24e   : > { %2623 = vmatprep.subr.bf16.mxu1 %v2903_v44  ;;  %2668 = vmatprep.subr.bf16.mxu0 %v2903_v44  ;;  %v2720_v57 = vpack.c.bf16 %v2067_v55, %v2066_v54 }
 0x251   : > { %2625 = vmatpush3.bf16.msra.mxu1 %v2624_v63  ;;  %2670 = vmatpush3.bf16.msra.mxu0 %v2669_v0  ;;  %v1642_v63 = vrot.slane %v3645_v37, 4  ;;  %v2070_v0 = vld [vmem:[%s3953_s5 + $0x310] sm:$0xff] }
 0x252   : > { %2671 = vmatprep.subr.bf16.mxu0 %v2903_v44  ;;  %v2726_v2 = vpack.c.bf16 %v2071_v1, %v2070_v0 }
 0x254   : > { %2275 = vmatmul.mubr.f32.vlgmr.msra.gmra.mrb[16].mxu1 %v1284_v5 }
 0x255   : > { %2673 = vmatpush3.bf16.msra.mxu0 %v2672_v3  ;;  %v2073_v3 = vld [vmem:[%s3953_s5 + $0x328] sm:$0xff] }
 0x256   : > { %2674 = vmatprep.subr.bf16.mxu0 %v2903_v44 }
 0x258   : > { %2345 = vmatmul.mubr.f32.vlgmr.msra.gmra.mrb[8].mxu0 %v1463_v10  ;;  %v2077_v10 = vld [vmem:[%s3953_s5 + $0x348] sm:$0xff] }
 0x259   : > { %2676 = vmatpush3.bf16.msra.mxu0 %v2675_v9  ;;  %2379 = vmatprep.mubr.msk.f32.mxu0 %vm2904_vm6, %v2901_v7  ;;  %v2076_v9 = vld [vmem:[%s3953_s5 + $0x340] sm:$0xff] }
 0x25a   : > { %2677 = vmatprep.subr.bf16.mxu0 %v2903_v44  ;;  %v2735_v4 = vpack.c.bf16 %v2077_v10, %v2076_v9 }
 0x25d   : > { %2679 = vmatpush3.bf16.msra.mxu0 %v2678_v12  ;;  %v2079_v12 = vld [vmem:[%s3953_s5 + $0x358] sm:$0xff] }
 0x25e   : > { %2680 = vmatprep.subr.bf16.mxu0 %v2903_v44  ;;  %v2738_v13 = vpack.c.bf16 %v2079_v12, %v2078_v11 }
 0x261   : > { %2682 = vmatpush3.bf16.msra.mxu0 %v2681_v15  ;;  %v2081_v15 = vld [vmem:[%s3953_s5 + $0x368] sm:$0xff] }
 0x262   : > { %2683 = vmatprep.subr.bf16.mxu0 %v2903_v44  ;;  %v2741_v16 = vpack.c.bf16 %v2081_v15, %v2080_v14 }
 0x265   : > { %2685 = vmatpush3.bf16.msra.mxu0 %v2684_v18  ;;  %v2083_v18 = vld [vmem:[%s3953_s5 + $0x378] sm:$0xff] }
 0x266   : > { %2686 = vmatprep.subr.bf16.mxu0 %v2903_v44  ;;  %v2744_v19 = vpack.c.bf16 %v2083_v18, %v2082_v17 }
 0x269   : > { %2688 = vmatpush3.bf16.msra.mxu0 %v2687_v21 }
 0x26a   : > { %2689 = vmatprep.subr.bf16.mxu0 %v2903_v44 }
 0x26d   : > { %2691 = vmatpush3.bf16.msra.mxu0 %v2690_v25 }
 0x26e   : > { %2692 = vmatprep.subr.bf16.mxu0 %v2903_v44 }
 0x271   : > { %2694 = vmatpush3.bf16.msra.mxu0 %v2693_v29 }
 0x272   : > { %2695 = vmatprep.subr.bf16.mxu0 %v2903_v44 }
 0x275   : > { %2697 = vmatpush3.bf16.msra.mxu0 %v2696_v33 }
 0x276   : > { %2698 = vmatprep.subr.bf16.mxu0 %v2903_v44 }
 0x278   : > { %2380 = vmatmul.mubr.f32.vlgmr.msra.gmra.mrb[8].mxu0 %v3645_v37  ;;  %v2072_v37 = vld [vmem:[%s3953_s5 + $0x320] sm:$0xff] }
 0x279   : > { %2700 = vmatpush3.bf16.msra.mxu0 %v2699_v36  ;;  %2414 = vmatprep.mubr.msk.f32.mxu0 %vm2904_vm6, %v2901_v7  ;;  %v2729_v5 = vpack.c.bf16 %v2073_v3, %v2072_v37 }
 0x27a   : > { %2701 = vmatprep.subr.bf16.mxu0 %v2903_v44 }
 0x27d   : > { %2703 = vmatpush3.bf16.msra.mxu0 %v2702_v40 }
 0x27e   : > { %2704 = vmatprep.subr.bf16.mxu0 %v2903_v44 }
 0x281   : > { %2706 = vmatpush3.bf16.msra.mxu0 %v2705_v43 }
 0x282   : > { %2707 = vmatprep.subr.bf16.mxu0 %v2903_v44 }
 0x285   : > { %2709 = vmatpush3.bf16.msra.mxu0 %v2708_v47 }
 0x286   : > { %2710 = vmatprep.subr.bf16.mxu0 %v2903_v44 }
 0x289   : > { %2712 = vmatpush3.bf16.msra.mxu0 %v2711_v56 }
 0x28a   : > { %2713 = vmatprep.subr.bf16.mxu0 %v2903_v44 }
 0x28d   : > { %2715 = vmatpush3.bf16.msra.mxu0 %v2714_v50 }
 0x28e   : > { %2716 = vmatprep.subr.bf16.mxu0 %v2903_v44 }
 0x291   : > { %2718 = vmatpush3.bf16.msra.mxu0 %v2717_v53 }
 0x292   : > { %2719 = vmatprep.subr.bf16.mxu0 %v2903_v44 }
 0x295   : > { %2721 = vmatpush3.bf16.msra.mxu0 %v2720_v57 }
 0x296   : > { %2722 = vmatprep.subr.bf16.mxu0 %v2903_v44 }
 0x298   : > { %2415 = vmatmul.mubr.f32.vlgmr.msra.gmra.mrb[8].mxu0 %v1642_v63 }
 0x299   : > { %2724 = vmatpush3.bf16.msra.mxu0 %v2723_v61  ;;  %2449 = vmatprep.mubr.msk.f32.mxu0 %vm2904_vm6, %v2901_v7  ;;  %v2075_v7 = vld [vmem:[%s3953_s5 + $0x338] sm:$0xff] }
 0x29a   : > { %2725 = vmatprep.subr.bf16.mxu0 %v2903_v44  ;;  %v2732_v8 = vpack.c.bf16 %v2075_v7, %v2074_v6 }
 0x29d   : > { %2727 = vmatpush3.bf16.msra.mxu0 %v2726_v2 }
 0x29e   : > { %2728 = vmatprep.subr.bf16.mxu0 %v2903_v44 }
 0x2a1   : > { %2730 = vmatpush3.bf16.msra.mxu0 %v2729_v5 }
 0x2a2   : > { %2731 = vmatprep.subr.bf16.mxu0 %v2903_v44 }
 0x2a5   : > { %2733 = vmatpush3.bf16.msra.mxu0 %v2732_v8 }
 0x2a6   : > { %2734 = vmatprep.subr.bf16.mxu0 %v2903_v44 }
 0x2a9   : > { %2736 = vmatpush3.bf16.msra.mxu0 %v2735_v4 }
 0x2aa   : > { %2737 = vmatprep.subr.bf16.mxu0 %v2903_v44 }
 0x2ad   : > { %2739 = vmatpush3.bf16.msra.mxu0 %v2738_v13 }
 0x2ae   : > { %2740 = vmatprep.subr.bf16.mxu0 %v2903_v44 }
 0x2b1   : > { %2742 = vmatpush3.bf16.msra.mxu0 %v2741_v16 }
 0x2b2   : > { %2743 = vmatprep.subr.bf16.mxu0 %v2903_v44 }
 0x2b5   : > { %2745 = vmatpush3.bf16.msra.mxu0 %v2744_v19 }
 0x2b8   : > { %2450 = vmatmul.mubr.f32.vlgmr.msra.gmra.mrb[8].mxu0 %v1177_v30 }
 0x327   : > { %v1352_v20 = vpop.f32.mrb[16].mxu1 }
 0x328   : > { %v2276_v21 = vpop.f32.mrb[17].mxu1  ;;  %v2754_v24 = vadd.f32 %v1352_v20, %v1178_v23 }
 0x38b   : > { %v1798_v25 = vpop.f32.mrb[8].mxu0 }
 0x38c   : > { %v2755_v26 = vadd.f32 %v2754_v24, %v1798_v25  ;;  %v2451_v27 = vpop.f32.mrb[9].mxu0 }
 0x38e   : > { %v1804_v44 = vsel %vm1803_vm7, %v2755_v26, -inf }
 0x38f   : > { %1805 = vmax.xlane.f32.xlu0 %v1804_v44 }
 0x41c   : > { %v1806_v29 = vpop.xlane.xlu0 %1805 }
 0x41d   : > { %v1807_v31 = vsub.f32 %v2755_v26, %v1806_v29 }
 0x41f   : > { %v1808_v22 = vmul.f32 1.442695, %v1807_v31 }
 0x421   : > { %2833 = vpow2.f32 %v1808_v22 }
 0x42b   : > { %v2834_v28 = vpop.eup %2833 }
 0x42c   : > { %v1810_v30 = vsel %vm1803_vm7, %v2834_v28, 0.0 }
 0x42d   : > { %1811 = vadd.xlane.f32.xlu0 %v1810_v30 }
 0x4ba   : > { %v1812_v32 = vpop.xlane.xlu0 %1811 }
 0x4bb   : > { %2835 = vrcp.f32 %v1812_v32 }
 0x4c5   : > { %v2836_v33 = vpop.eup %2835 }
 0x4c6   : > { %v1814_v34 = vmul.f32 %v2836_v33, %v2834_v28 }
 0x4c8   : > { %1815 = vst.msk [vmem:[%s270_s16] sm:$0x1] %vm1803_vm7, %v1814_v34 }
 0x4c9   : > { %2850 = shalt.err (!%p2847_p3)
}
 0x4ca   : > { %s2851_s9 = scalar_lea.hbm %s3905_s15, 16  ;;  %s2855_s20 = scalar_lea.hbm %s3955_s7, 32 }
 0x4cb   : > { %p2852_p4 = scmp.ne.s32.totalorder %s3905_s15, %s2851_s9  ;;  %p2856_p9 = scmp.lt.u32.totalorder %s3905_s15, %s3955_s7 }
 0x4cc   : > { %p2857_p10 = scmp.lt.u32.totalorder %s2855_s20, %s2851_s9  ;;  %p2859_p12 = scmp.lt.u32.totalorder %s2851_s9, %s3905_s15 }
 0x4cd   : > { %p2853_p7 = pnand %p2852_p4, %p2984_p5 }
 0x4ce   : > { %p2858_p11 = por %p2857_p10, %p2856_p9 }
 0x4cf   : > { %p2854_p8 = pneg %p2853_p7 }
 0x4d0   : > { %p2860_p13 = por %p2859_p12, %p2858_p11 }
 0x4d2   : > { %p2861_p0 = pnand %p2860_p13, %p2854_p8 }
 0x4d4   : > { %2864 = shalt.err (!%p2861_p0)
}
 0x4d5   : > { %2790 = dma.vmem_to_hbm [thread:$0]  (%p2984_p5), %s3907_s17, 16, %s3905_s15, %s1817_s21  }
 0x4d6 PF: > { %p2796_p1 = scmp.ge.s32.totalorder %s2899_s27, 2  ;;  %s1841_s18 = sand.u32 1, %s2887_s24  }
 0x4d7   : > { %s1842_s19 = scalar_lea.sflag [#allocation4], %s1841_s18 }
 0x4d8   : > { %p2793_p2 = pnand %p2796_p1, %p2988_p6 }
 0x4da   : > { %2882 = dma.done.wait (!%p2793_p2), %s1842_s19, 16  }
 0x4db   : > { %2884 = vsyncadd (!%p2793_p2), %s1842_s19, 4294967280  ;;  %p17_p3 = scmp.ge.s32.totalorder %s2971_s30, 4   ;;  %s3960_s24 = smov %s2891_s25 }
 0x4dc   : > { %s3961_s25 = smov %s2895_s26  ;;  %s3962_s26 = smov %s2982_s10 }
 0x4dd   : > { %s3963_s27 = smov %s2971_s30  ;;  %19 = sbr.rel (!%p17_p3) target bundleno = 3 (0x3), region = 93 }
 0x4e4   :  { %1846 = vsyncpa [#allocation4], 1 }
 0x4e5   :  { %1848 = vsyncpa [#allocation4 + $0x1], 1 }

</bundles_post_ra>
